<compile_context>
chip_gen: v6e
topology: v6e:2x2x1
jax: 0.10.0
libtpu: 0.0.40
codegen_flags: <defaults>
</compile_context>

<pallas_src>
import jax
import jax.numpy as jnp
from jax.experimental import pallas as pl
from jax.experimental.pallas import tpu as pltpu

INPUT_SIZE = 600
HIDDEN = [512, 256, 128, 64]
HEAD_HIDDEN = 32
OUT_DIM = 2
BN_EPS = 1e-5
MAX_BATCH_TILE = 1024


# ---------------------------------------------------------------------------
# Kernel: fused MLP — 4 x (Linear[BN-folded] + ReLU) + fused 2-head output.
# ---------------------------------------------------------------------------
def _regressor_kernel(x_ref, *refs):
    o_ref = refs[-1]
    p = refs[:-1]

    # In-kernel cast (no wrapper pad/cast pass); f32 -> bf16 on the VPU.
    h = x_ref[...].astype(jnp.bfloat16)              # (tile_b, 600)

    idx = 0
    for _ in range(len(HIDDEN)):
        w, b = p[idx], p[idx + 1]
        idx += 2
        # bf16 x bf16 matmul, f32 accumulation on the MXU; bias + ReLU in f32.
        z = jnp.dot(h, w[...], preferred_element_type=jnp.float32) + b[...]
        h = jnp.maximum(z, 0.0).astype(jnp.bfloat16)  # BN folded; Dropout = id

    wh1, bh1, wh2, bh2 = p[idx:idx + 4]
    hh = jnp.dot(h, wh1[...], preferred_element_type=jnp.float32) + bh1[...]
    hh = jnp.maximum(hh, 0.0).astype(jnp.bfloat16)    # both heads' hidden (tile_b, 64)
    # block-diagonal (64, 2) second stage == torch.cat([L_ecran, gap], dim=1)
    o_ref[...] = jnp.dot(hh, wh2[...], preferred_element_type=jnp.float32) + bh2[...]


# ---------------------------------------------------------------------------
# Parameter construction (mirrors the PyTorch module's _init_weights).
# ---------------------------------------------------------------------------
def init_raw_params(key):
    """kaiming_normal_(mode='fan_out', relu) Linear weights, zero biases,
    BN gamma=1 / beta=0 with running_mean=0 / running_var=1 (eval mode)."""
    sizes = [INPUT_SIZE] + HIDDEN
    keys = jax.random.split(key, len(HIDDEN) + 4)

    layers = []
    for i in range(len(HIDDEN)):
        fan_in, fan_out = sizes[i], sizes[i + 1]
        std = (2.0 / fan_out) ** 0.5                 # fan_out mode, relu gain
        w = std * jax.random.normal(keys[i], (fan_in, fan_out), jnp.float32)
        b = jnp.zeros((fan_out,), jnp.float32)
        gamma = jnp.ones((fan_out,), jnp.float32)
        beta = jnp.zeros((fan_out,), jnp.float32)
        rmean = jnp.zeros((fan_out,), jnp.float32)
        rvar = jnp.ones((fan_out,), jnp.float32)
        layers.append((w, b, gamma, beta, rmean, rvar))

    hk = keys[len(HIDDEN):]
    heads = []
    for j in range(2):                               # L_ecran head, gap head
        std1 = (2.0 / HEAD_HIDDEN) ** 0.5
        w1 = std1 * jax.random.normal(hk[2 * j], (HIDDEN[-1], HEAD_HIDDEN), jnp.float32)
        b1 = jnp.zeros((HEAD_HIDDEN,), jnp.float32)
        std2 = (2.0 / 1) ** 0.5
        w2 = std2 * jax.random.normal(hk[2 * j + 1], (HEAD_HIDDEN, 1), jnp.float32)
        b2 = jnp.zeros((1,), jnp.float32)
        heads.append((w1, b1, w2, b2))

    return {"layers": layers, "heads": heads}


def pack_params(raw, weight_dtype=jnp.bfloat16):
    """Host-side constant folding: fold BN into Linear, fuse the two heads,
    cast weights to `weight_dtype` (biases stay f32)."""
    packed = []
    for (w, b, gamma, beta, mu, var) in raw["layers"]:
        s = gamma / jnp.sqrt(var + BN_EPS)           # (out,)
        wf = w * s[None, :]
        bf = b * s + (beta - mu * s)
        packed += [wf.astype(weight_dtype), bf.reshape(1, -1).astype(jnp.float32)]

    (wl1, bl1, wl2, bl2), (wg1, bg1, wg2, bg2) = raw["heads"]
    wh1 = jnp.concatenate([wl1, wg1], axis=1)        # (64, 64)
    bh1 = jnp.concatenate([bl1, bg1]).reshape(1, 2 * HEAD_HIDDEN)
    wh2 = jnp.zeros((2 * HEAD_HIDDEN, OUT_DIM), jnp.float32)
    wh2 = wh2.at[:HEAD_HIDDEN, 0].set(wl2[:, 0])
    wh2 = wh2.at[HEAD_HIDDEN:, 1].set(wg2[:, 0])     # block-diagonal second stage
    bh2 = jnp.concatenate([bl2, bg2]).reshape(1, OUT_DIM)
    packed += [wh1.astype(weight_dtype), bh1.astype(jnp.float32),
               wh2.astype(weight_dtype), bh2.astype(jnp.float32)]
    return packed


# ---------------------------------------------------------------------------
# Wrapper
# ---------------------------------------------------------------------------
def _pick_batch_tile(B):
    # >=2 grid steps (v7x megacore sharding), sublane-aligned, VMEM-safe cap.
    tile = -(-B // 2)                  # cdiv(B, 2)
    tile = ((tile + 7) // 8) * 8       # round up to sublane multiple
    return max(8, min(MAX_BATCH_TILE, tile))


@jax.jit
def optimized_regressor_forward(x, packed_params):
    B = x.shape[0]
    tile = _pick_batch_tile(B)         # static at trace time (derived from shape)
    grid = (pl.cdiv(B, tile),)

    in_specs = [pl.BlockSpec((tile, INPUT_SIZE), lambda i: (i, 0))]
    for prm in packed_params:
        # All weights/biases are small; full-array blocks, constant index_map.
        in_specs.append(pl.BlockSpec(prm.shape, lambda i: (0, 0)))
    out_spec = pl.BlockSpec((tile, OUT_DIM), lambda i: (i, 0))

    dims = [INPUT_SIZE] + HIDDEN + [2 * HEAD_HIDDEN, OUT_DIM]
    flops = 2 * B * sum(dims[i] * dims[i + 1] for i in range(len(dims) - 1))
    weight_bytes = sum(int(p.size) * p.dtype.itemsize for p in packed_params)
    bytes_accessed = B * INPUT_SIZE * 4 + B * OUT_DIM * 4 + weight_bytes

    return pl.pallas_call(
        _regressor_kernel,
        out_shape=jax.ShapeDtypeStruct((B, OUT_DIM), jnp.float32),
        grid_spec=pltpu.PrefetchScalarGridSpec(
            num_scalar_prefetch=0,
            grid=grid,
            in_specs=in_specs,
            out_specs=out_spec,
        ),
        compiler_params=pltpu.CompilerParams(
            dimension_semantics=("parallel",),
            vmem_limit_bytes=32 * 1024 * 1024,
        ),
        cost_estimate=pl.CostEstimate(
            flops=int(flops), transcendentals=0, bytes_accessed=int(bytes_accessed)),
    )(x, *packed_params)


# ---------------------------------------------------------------------------
# Pure-JAX references (for correctness checks).
# ---------------------------------------------------------------------------
def _reference_raw(x, raw):
    """f32 forward with explicit eval-mode BatchNorm (PyTorch semantics)."""
    h = x
    for (w, b, gamma, beta, mu, var) in raw["layers"]:
        z = h @ w + b
        h = jnp.maximum(gamma * (z - mu) / jnp.sqrt(var + BN_EPS) + beta, 0.0)
    (wl1, bl1, wl2, bl2), (wg1, bg1, wg2, bg2) = raw["heads"]
    l = jnp.maximum(h @ wl1 + bl1, 0.0) @ wl2 + bl2
    g = jnp.maximum(h @ wg1 + bg1, 0.0) @ wg2 + bg2
    return jnp.concatenate([l, g], axis=1)


def _reference_packed(x, packed):
    """Same math as the kernel (folded BN, fused heads, same dtypes)."""
    dt = packed[0].dtype
    h = x.astype(dt)
    idx = 0
    for _ in range(len(HIDDEN)):
        w, b = packed[idx], packed[idx + 1]
        idx += 2
        z = jnp.dot(h, w, preferred_element_type=jnp.float32) + b
        h = jnp.maximum(z, 0.0).astype(dt)
    wh1, bh1, wh2, bh2 = packed[idx:idx + 4]
    hh = jnp.maximum(jnp.dot(h, wh1, preferred_element_type=jnp.float32) + bh1, 0.0).astype(dt)
    return jnp.dot(hh, wh2, preferred_element_type=jnp.float32) + bh2


if __name__ == "__main__":
    key = jax.random.PRNGKey(0)
    kx, kp = jax.random.split(key)

    # B chosen NOT a multiple of the batch tile: tile = round_up(cdiv(70,2),8)=40,
    # grid = 2 steps with a masked partial last block of 30 rows.
    B = 70
    x = jax.random.normal(kx, (B, INPUT_SIZE), jnp.float32)

    raw = init_raw_params(kp)
    packed_bf16 = pack_params(raw, jnp.bfloat16)      # kernel params
    packed_f32 = pack_params(raw, jnp.float32)        # for fold/fuse validation

    out = optimized_regressor_forward(x, packed_bf16)
    out = jax.block_until_ready(out)
    assert out.shape == (B, 2) and out.dtype == jnp.float32

    ref_raw = _reference_raw(x, raw)
    ref_pk_f32 = _reference_packed(x, packed_f32)
    ref_pk_bf16 = _reference_packed(x, packed_bf16)

    # 1) BN-fold + head-fusion are exact transformations (f32).
    assert jnp.allclose(ref_pk_f32, ref_raw, atol=1e-2, rtol=1e-3)
    # 2) Kernel matches identical-precision (bf16 matmul, f32 accum) math,
    #    including the masked partial last block.
    assert jnp.allclose(out, ref_pk_bf16, atol=2e-2, rtol=2e-2)
    # 3) Loose end-to-end check vs. the full-f32 module semantics
    #    (difference is just bf16 weight/activation quantization).
    assert jnp.allclose(out, ref_raw, atol=1.0, rtol=5e-2)

    print("KERNEL_OK")
</pallas_src>

<mosaic_0001>
module attributes {stable_mosaic.version = 11 : i64} {
  func.func @_regressor_kernel(%arg0: i32, %arg1: memref<40x600xf32, #tpu.memory_space<vmem>>, %arg2: memref<600x512xbf16, #tpu.memory_space<vmem>>, %arg3: memref<1x512xf32, #tpu.memory_space<vmem>>, %arg4: memref<512x256xbf16, #tpu.memory_space<vmem>>, %arg5: memref<1x256xf32, #tpu.memory_space<vmem>>, %arg6: memref<256x128xbf16, #tpu.memory_space<vmem>>, %arg7: memref<1x128xf32, #tpu.memory_space<vmem>>, %arg8: memref<128x64xbf16, #tpu.memory_space<vmem>>, %arg9: memref<1x64xf32, #tpu.memory_space<vmem>>, %arg10: memref<64x64xbf16, #tpu.memory_space<vmem>>, %arg11: memref<1x64xf32, #tpu.memory_space<vmem>>, %arg12: memref<64x2xbf16, #tpu.memory_space<vmem>>, %arg13: memref<1x2xf32, #tpu.memory_space<vmem>>, %arg14: memref<40x2xf32, #tpu.memory_space<vmem>>) attributes {dimension_semantics = [#tpu.dimension_semantics<parallel>], iteration_bounds = array<i64: 2>, scalar_prefetch = 0 : i64, scratch_operands = 0 : i64, tpu.core_type = #tpu.core_type<tc>, window_params = [{transform_indices = @transform_0, window_bounds = array<i64: 40, 600>}, {pipeline_mode = #tpu.pipeline_mode<synchronous>, transform_indices = @transform_1, window_bounds = array<i64: 600, 512>}, {pipeline_mode = #tpu.pipeline_mode<synchronous>, transform_indices = @transform_2, window_bounds = array<i64: 1, 512>}, {pipeline_mode = #tpu.pipeline_mode<synchronous>, transform_indices = @transform_3, window_bounds = array<i64: 512, 256>}, {pipeline_mode = #tpu.pipeline_mode<synchronous>, transform_indices = @transform_4, window_bounds = array<i64: 1, 256>}, {pipeline_mode = #tpu.pipeline_mode<synchronous>, transform_indices = @transform_5, window_bounds = array<i64: 256, 128>}, {pipeline_mode = #tpu.pipeline_mode<synchronous>, transform_indices = @transform_6, window_bounds = array<i64: 1, 128>}, {pipeline_mode = #tpu.pipeline_mode<synchronous>, transform_indices = @transform_7, window_bounds = array<i64: 128, 64>}, {pipeline_mode = #tpu.pipeline_mode<synchronous>, transform_indices = @transform_8, window_bounds = array<i64: 1, 64>}, {pipeline_mode = #tpu.pipeline_mode<synchronous>, transform_indices = @transform_9, window_bounds = array<i64: 64, 64>}, {pipeline_mode = #tpu.pipeline_mode<synchronous>, transform_indices = @transform_10, window_bounds = array<i64: 1, 64>}, {pipeline_mode = #tpu.pipeline_mode<synchronous>, transform_indices = @transform_11, window_bounds = array<i64: 64, 2>}, {pipeline_mode = #tpu.pipeline_mode<synchronous>, transform_indices = @transform_12, window_bounds = array<i64: 1, 2>}, {transform_indices = @transform_13, window_bounds = array<i64: 40, 2>}]} {
    %c0 = arith.constant 0 : index
    %c0_0 = arith.constant 0 : index
    %0 = vector.load %arg1[%c0, %c0_0] : memref<40x600xf32, #tpu.memory_space<vmem>>, vector<40x600xf32>
    %1 = arith.truncf %0 : vector<40x600xf32> to vector<40x600xbf16>
    %c0_1 = arith.constant 0 : index
    %c0_2 = arith.constant 0 : index
    %2 = vector.load %arg2[%c0_1, %c0_2] : memref<600x512xbf16, #tpu.memory_space<vmem>>, vector<600x512xbf16>
    %cst = arith.constant dense<0.000000e+00> : vector<40x512xf32>
    %3 = tpu.matmul %1, %2, %cst {dimension_numbers = #tpu.dot_dimension_numbers<[1], [0], [0], [1], [0, 0, 1, 1], [], []>} : vector<40x600xbf16>, vector<600x512xbf16>, vector<40x512xf32> -> vector<40x512xf32>
    %c0_3 = arith.constant 0 : index
    %c0_4 = arith.constant 0 : index
    %4 = vector.load %arg3[%c0_3, %c0_4] : memref<1x512xf32, #tpu.memory_space<vmem>>, vector<1x512xf32>
    %5 = vector.broadcast %4 : vector<1x512xf32> to vector<40x512xf32>
    %6 = arith.addf %3, %5 : vector<40x512xf32>
    %cst_5 = arith.constant 0.000000e+00 : f32
    %7 = vector.broadcast %cst_5 : f32 to vector<40x512xf32>
    %8 = arith.maximumf %6, %7 : vector<40x512xf32>
    %9 = arith.truncf %8 : vector<40x512xf32> to vector<40x512xbf16>
    %c0_6 = arith.constant 0 : index
    %c0_7 = arith.constant 0 : index
    %10 = vector.load %arg4[%c0_6, %c0_7] : memref<512x256xbf16, #tpu.memory_space<vmem>>, vector<512x256xbf16>
    %cst_8 = arith.constant dense<0.000000e+00> : vector<40x256xf32>
    %11 = tpu.matmul %9, %10, %cst_8 {dimension_numbers = #tpu.dot_dimension_numbers<[1], [0], [0], [1], [0, 0, 1, 1], [], []>} : vector<40x512xbf16>, vector<512x256xbf16>, vector<40x256xf32> -> vector<40x256xf32>
    %c0_9 = arith.constant 0 : index
    %c0_10 = arith.constant 0 : index
    %12 = vector.load %arg5[%c0_9, %c0_10] : memref<1x256xf32, #tpu.memory_space<vmem>>, vector<1x256xf32>
    %13 = vector.broadcast %12 : vector<1x256xf32> to vector<40x256xf32>
    %14 = arith.addf %11, %13 : vector<40x256xf32>
    %cst_11 = arith.constant 0.000000e+00 : f32
    %15 = vector.broadcast %cst_11 : f32 to vector<40x256xf32>
    %16 = arith.maximumf %14, %15 : vector<40x256xf32>
    %17 = arith.truncf %16 : vector<40x256xf32> to vector<40x256xbf16>
    %c0_12 = arith.constant 0 : index
    %c0_13 = arith.constant 0 : index
    %18 = vector.load %arg6[%c0_12, %c0_13] : memref<256x128xbf16, #tpu.memory_space<vmem>>, vector<256x128xbf16>
    %cst_14 = arith.constant dense<0.000000e+00> : vector<40x128xf32>
    %19 = tpu.matmul %17, %18, %cst_14 {dimension_numbers = #tpu.dot_dimension_numbers<[1], [0], [0], [1], [0, 0, 1, 1], [], []>} : vector<40x256xbf16>, vector<256x128xbf16>, vector<40x128xf32> -> vector<40x128xf32>
    %c0_15 = arith.constant 0 : index
    %c0_16 = arith.constant 0 : index
    %20 = vector.load %arg7[%c0_15, %c0_16] : memref<1x128xf32, #tpu.memory_space<vmem>>, vector<1x128xf32>
    %21 = vector.broadcast %20 : vector<1x128xf32> to vector<40x128xf32>
    %22 = arith.addf %19, %21 : vector<40x128xf32>
    %cst_17 = arith.constant 0.000000e+00 : f32
    %23 = vector.broadcast %cst_17 : f32 to vector<40x128xf32>
    %24 = arith.maximumf %22, %23 : vector<40x128xf32>
    %25 = arith.truncf %24 : vector<40x128xf32> to vector<40x128xbf16>
    %c0_18 = arith.constant 0 : index
    %c0_19 = arith.constant 0 : index
    %26 = vector.load %arg8[%c0_18, %c0_19] : memref<128x64xbf16, #tpu.memory_space<vmem>>, vector<128x64xbf16>
    %cst_20 = arith.constant dense<0.000000e+00> : vector<40x64xf32>
    %27 = tpu.matmul %25, %26, %cst_20 {dimension_numbers = #tpu.dot_dimension_numbers<[1], [0], [0], [1], [0, 0, 1, 1], [], []>} : vector<40x128xbf16>, vector<128x64xbf16>, vector<40x64xf32> -> vector<40x64xf32>
    %c0_21 = arith.constant 0 : index
    %c0_22 = arith.constant 0 : index
    %28 = vector.load %arg9[%c0_21, %c0_22] : memref<1x64xf32, #tpu.memory_space<vmem>>, vector<1x64xf32>
    %29 = vector.broadcast %28 : vector<1x64xf32> to vector<40x64xf32>
    %30 = arith.addf %27, %29 : vector<40x64xf32>
    %cst_23 = arith.constant 0.000000e+00 : f32
    %31 = vector.broadcast %cst_23 : f32 to vector<40x64xf32>
    %32 = arith.maximumf %30, %31 : vector<40x64xf32>
    %33 = arith.truncf %32 : vector<40x64xf32> to vector<40x64xbf16>
    %c0_24 = arith.constant 0 : index
    %c0_25 = arith.constant 0 : index
    %34 = vector.load %arg10[%c0_24, %c0_25] : memref<64x64xbf16, #tpu.memory_space<vmem>>, vector<64x64xbf16>
    %cst_26 = arith.constant dense<0.000000e+00> : vector<40x64xf32>
    %35 = tpu.matmul %33, %34, %cst_26 {dimension_numbers = #tpu.dot_dimension_numbers<[1], [0], [0], [1], [0, 0, 1, 1], [], []>} : vector<40x64xbf16>, vector<64x64xbf16>, vector<40x64xf32> -> vector<40x64xf32>
    %c0_27 = arith.constant 0 : index
    %c0_28 = arith.constant 0 : index
    %36 = vector.load %arg11[%c0_27, %c0_28] : memref<1x64xf32, #tpu.memory_space<vmem>>, vector<1x64xf32>
    %37 = vector.broadcast %36 : vector<1x64xf32> to vector<40x64xf32>
    %38 = arith.addf %35, %37 : vector<40x64xf32>
    %cst_29 = arith.constant 0.000000e+00 : f32
    %39 = vector.broadcast %cst_29 : f32 to vector<40x64xf32>
    %40 = arith.maximumf %38, %39 : vector<40x64xf32>
    %41 = arith.truncf %40 : vector<40x64xf32> to vector<40x64xbf16>
    %c0_30 = arith.constant 0 : index
    %c0_31 = arith.constant 0 : index
    %42 = vector.load %arg12[%c0_30, %c0_31] : memref<64x2xbf16, #tpu.memory_space<vmem>>, vector<64x2xbf16>
    %cst_32 = arith.constant dense<0.000000e+00> : vector<40x2xf32>
    %43 = tpu.matmul %41, %42, %cst_32 {dimension_numbers = #tpu.dot_dimension_numbers<[1], [0], [0], [1], [0, 0, 1, 1], [], []>} : vector<40x64xbf16>, vector<64x2xbf16>, vector<40x2xf32> -> vector<40x2xf32>
    %c0_33 = arith.constant 0 : index
    %c0_34 = arith.constant 0 : index
    %44 = vector.load %arg13[%c0_33, %c0_34] : memref<1x2xf32, #tpu.memory_space<vmem>>, vector<1x2xf32>
    %45 = vector.broadcast %44 : vector<1x2xf32> to vector<40x2xf32>
    %46 = arith.addf %43, %45 : vector<40x2xf32>
    %c0_35 = arith.constant 0 : index
    %c0_36 = arith.constant 0 : index
    %47 = vector.load %arg14[%c0_35, %c0_36] : memref<40x2xf32, #tpu.memory_space<vmem>>, vector<40x2xf32>
    tpu.vector_store %arg14[%c0_35, %c0_36], %46 {strides = array<i32>} : memref<40x2xf32, #tpu.memory_space<vmem>>, vector<40x2xf32>,
    return
  }
  func.func @transform_0(%arg0: i32) -> (i32, i32) {
    %c0_i32 = arith.constant 0 : i32
    %c0_i32_0 = arith.constant 0 : i32
    return %arg0, %c0_i32 : i32, i32
  }
  func.func @transform_1(%arg0: i32) -> (i32, i32) {
    %c0_i32 = arith.constant 0 : i32
    %c0_i32_0 = arith.constant 0 : i32
    %c0_i32_1 = arith.constant 0 : i32
    return %c0_i32, %c0_i32_0 : i32, i32
  }
  func.func @transform_2(%arg0: i32) -> (i32, i32) {
    %c0_i32 = arith.constant 0 : i32
    %c0_i32_0 = arith.constant 0 : i32
    %c0_i32_1 = arith.constant 0 : i32
    return %c0_i32, %c0_i32_0 : i32, i32
  }
  func.func @transform_3(%arg0: i32) -> (i32, i32) {
    %c0_i32 = arith.constant 0 : i32
    %c0_i32_0 = arith.constant 0 : i32
    %c0_i32_1 = arith.constant 0 : i32
    return %c0_i32, %c0_i32_0 : i32, i32
  }
  func.func @transform_4(%arg0: i32) -> (i32, i32) {
    %c0_i32 = arith.constant 0 : i32
    %c0_i32_0 = arith.constant 0 : i32
    %c0_i32_1 = arith.constant 0 : i32
    return %c0_i32, %c0_i32_0 : i32, i32
  }
  func.func @transform_5(%arg0: i32) -> (i32, i32) {
    %c0_i32 = arith.constant 0 : i32
    %c0_i32_0 = arith.constant 0 : i32
    %c0_i32_1 = arith.constant 0 : i32
    return %c0_i32, %c0_i32_0 : i32, i32
  }
  func.func @transform_6(%arg0: i32) -> (i32, i32) {
    %c0_i32 = arith.constant 0 : i32
    %c0_i32_0 = arith.constant 0 : i32
    %c0_i32_1 = arith.constant 0 : i32
    return %c0_i32, %c0_i32_0 : i32, i32
  }
  func.func @transform_7(%arg0: i32) -> (i32, i32) {
    %c0_i32 = arith.constant 0 : i32
    %c0_i32_0 = arith.constant 0 : i32
    %c0_i32_1 = arith.constant 0 : i32
    return %c0_i32, %c0_i32_0 : i32, i32
  }
  func.func @transform_8(%arg0: i32) -> (i32, i32) {
    %c0_i32 = arith.constant 0 : i32
    %c0_i32_0 = arith.constant 0 : i32
    %c0_i32_1 = arith.constant 0 : i32
    return %c0_i32, %c0_i32_0 : i32, i32
  }
  func.func @transform_9(%arg0: i32) -> (i32, i32) {
    %c0_i32 = arith.constant 0 : i32
    %c0_i32_0 = arith.constant 0 : i32
    %c0_i32_1 = arith.constant 0 : i32
    return %c0_i32, %c0_i32_0 : i32, i32
  }
  func.func @transform_10(%arg0: i32) -> (i32, i32) {
    %c0_i32 = arith.constant 0 : i32
    %c0_i32_0 = arith.constant 0 : i32
    %c0_i32_1 = arith.constant 0 : i32
    return %c0_i32, %c0_i32_0 : i32, i32
  }
  func.func @transform_11(%arg0: i32) -> (i32, i32) {
    %c0_i32 = arith.constant 0 : i32
    %c0_i32_0 = arith.constant 0 : i32
    %c0_i32_1 = arith.constant 0 : i32
    return %c0_i32, %c0_i32_0 : i32, i32
  }
  func.func @transform_12(%arg0: i32) -> (i32, i32) {
    %c0_i32 = arith.constant 0 : i32
    %c0_i32_0 = arith.constant 0 : i32
    %c0_i32_1 = arith.constant 0 : i32
    return %c0_i32, %c0_i32_0 : i32, i32
  }
  func.func @transform_13(%arg0: i32) -> (i32, i32) {
    %c0_i32 = arith.constant 0 : i32
    %c0_i32_0 = arith.constant 0 : i32
    return %arg0, %c0_i32 : i32, i32
  }
}

</mosaic_0001>

<bundles_post_ra>
// kernel: optimized_regressor_forward.1
= control target key start
LH: loop header
LB: loop body
LE: loop exit
PB: predicated region body
PF: predicated region fallthrough
CT: control target
= control target key end

     0   :  { %s4978_s0 = inlined_call_operand.hbm [shape: f32[70,600], index: 0, kind: input, shape index: {}]   ;;  %s4979_s1 = inlined_call_operand.hbm [shape: bf16[600,512], index: 1, kind: input, shape index: {}]   ;;  %s4980_s2 = inlined_call_operand.vmem [shape: f32[1,512], index: 2, kind: input, shape index: {}]   ;;  %s4981_s3 = inlined_call_operand.hbm [shape: bf16[512,256], index: 3, kind: input, shape index: {}]   ;;  %s4982_s4 = inlined_call_operand.vmem [shape: f32[1,256], index: 4, kind: input, shape index: {}]   ;;  %s4983_s5 = inlined_call_operand.vmem [shape: bf16[256,128], index: 5, kind: input, shape index: {}]   ;;  %s4984_s6 = inlined_call_operand.vmem [shape: f32[1,128], index: 6, kind: input, shape index: {}]   ;;  %s4985_s7 = inlined_call_operand.vmem [shape: bf16[128,64], index: 7, kind: input, shape index: {}]   ;;  %s4986_s8 = inlined_call_operand.vmem [shape: f32[1,64], index: 8, kind: input, shape index: {}]   ;;  %s4987_s9 = inlined_call_operand.hbm [shape: bf16[64,64], index: 9, kind: input, shape index: {}]   ;;  %s4988_s10 = inlined_call_operand.vmem [shape: f32[1,64], index: 10, kind: input, shape index: {}]   ;;  %s4989_s11 = inlined_call_operand.vmem [shape: bf16[64,2], index: 11, kind: input, shape index: {}]   ;;  %s4990_s12 = inlined_call_operand.vmem [shape: f32[1,2], index: 12, kind: input, shape index: {}]   ;;  %s4991_s13 = inlined_call_operand.vmem [shape: f32[70,2], index: 13, kind: output, shape index: {}]  }
   0x1   :  { %4997 = sst [smem:[#allocation16_spill]] %s4990_s12 }
   0x2   :  { %4998 = sst [smem:[#allocation17_spill]] %s4991_s13 }
   0x3   :  { %18 = vsyncpa [#allocation3], 0 }
   0x4   :  { %20 = vsyncpa [#allocation3 + $0x1], 0 }
   0x5   :  { %21 = vsyncpa [#allocation5], 0 }
   0x6   :  { %22 = vsyncpa [#allocation8], 0  ;;  %s4488_s25 = smov 0   ;;  %s4490_s26 = smov 0  }
   0x7   :  { %s4492_s27 = smov 0   ;;  %s4494_s28 = smov 0  }
   0x8 LB: > { %s4507_s29 = sadd.s32 4294967295, %s4369_s28   ;;  %s4510_s30 = sadd.s32 1, %s4369_s28   ;;  %s4369_s28 = sphi %s4494_s28, %s5019_s28   ;;  %s4365_s27 = sphi %s4492_s27, %s5023_s27   ;;  %s4361_s26 = sphi %s4490_s26, %s5022_s26   ;;  %s4357_s25 = sphi %s4488_s25, %s5021_s25  }
   0x9   : > { %4999 = sst [smem:[#allocation13_spill]] %s4510_s30  ;;  %s32_s14 = ssub.s32 %s4369_s28, %s4510_s30 }
   0xa   : > { %s35_s15 = sadd.s32 1, %s4365_s27  ;;  %p33_p0 = scmp.eq.s32.totalorder %s32_s14, 0 }
   0xb   : > { %p42_p1 = scmp.ne.s32.totalorder %s4365_s27, %s4361_s26  ;;  %p43_p2 = scmp.eq.s32.totalorder %s4369_s28, 0 }
   0xc   : > { %p48_p3 = scmp.ne.s32.totalorder %s4361_s26, %s4357_s25  ;;  %p4994_p5 = scmp.eq.s32.totalorder %s4507_s29, 0 }
   0xd   : > { %s4520_s16 = scalar_select %p33_p0, %s4365_s27, %s35_s15  }
   0xe   : > { %p4522_p4 = por %p43_p2, %p42_p1  ;;  %p324_p6 = scmp.eq.s32.totalorder %s4507_s29, 1 }
   0xf   : > { %5000 = sst [smem:[#allocation14_spill]] %s4520_s16  ;;  %p3268_p7 = scmp.ge.s32.totalorder %s4369_s28, 1 }
  0x10   : > { %p4531_p8 = por %p4994_p5, %p48_p3  ;;  %p337_p9 = scmp.lt.s32.totalorder %s4369_s28, 3 }
  0x11   : > { %p4536_p10 = por %p324_p6, %p42_p1  ;;  %s4403_s21 = smov [#allocation4]  }
  0x12   : > { %s5002_s18 = scalar_select %p4531_p8, 1, 0 }
  0x13   : > { %s5003_s19 = scalar_select %p4536_p10, 1, 0 }
  0x14   : > { %p4540_p11 = pnand %p3268_p7, %p337_p9  ;;  %s349_s22 = sshll.u32 %s4403_s21, 4  ;;  %s350_s22 = int_to_ptr.vmem [resolvable:$true] %s349_s22 }
  0x15   : > { %5004 = sst [smem:[#allocation15_spill]] %s5003_s19  ;;  %s4404_s24 = smov [#allocation6]  }
  0x16   : > { %p3705_p12 = pneg %p4540_p11  ;;  %s365_s25 = sshll.u32 %s4404_s24, 4  ;;  %s366_s25 = int_to_ptr.vmem [resolvable:$true] %s365_s25 }
  0x17   : > { %s4202_s14 = scalar_lea.vmem %s350_s22, 19200  ;;  %p4210_p6 = scmp.lt.s32.totalorder %s350_s22, %s350_s22 }
  0x18   : > { %p4548_p13 = pnand %p3705_p12, %p4994_p5  ;;  %p4203_p1 = scmp.ne.s32.totalorder %s350_s22, %s4202_s14 }
  0x19   : > { %p4211_p7 = scmp.lt.s32.totalorder %s4202_s14, %s4202_s14 }
  0x1a   : > { %p4193_p0 = pneg %p4548_p13 }
  0x1b   : > { %p4212_p9 = por %p4211_p7, %p4210_p6 }
  0x1c   : > { %p4205_p2 = pnand %p4203_p1, %p4193_p0 }
  0x1e   : > { %p4206_p3 = pneg %p4205_p2 }
  0x20   : > { %p4213_p12 = pnand %p4212_p9, %p4206_p3 }
  0x22   : > { %4216 = shalt.err (!%p4213_p12)
}
  0x23   : > { %s4405_s15 = smov 256   ;;  %s4406_s21 = smov 16  }
  0x24   : > { %3708 = dma.hbm_to_vmem [thread:$0]  (!%p4548_p13), %s4979_s1, 19200, %s350_s22, [#allocation5], %s4405_s15, %s4405_s15, %s4406_s21  }
  0x25   : > { %s4228_s30 = scalar_lea.vmem %s366_s25, 8192  ;;  %p4236_p10 = scmp.lt.s32.totalorder %s366_s25, %s366_s25 }
  0x26   : > { %p4229_p5 = scmp.ne.s32.totalorder %s366_s25, %s4228_s30  ;;  %p4237_p8 = scmp.lt.s32.totalorder %s4228_s30, %s4228_s30 }
  0x28   : > { %p4231_p1 = pnand %p4229_p5, %p4193_p0  ;;  %p4238_p6 = por %p4237_p8, %p4236_p10 }
  0x2a   : > { %p4232_p2 = pneg %p4231_p1 }
  0x2c   : > { %p4239_p3 = pnand %p4238_p6, %p4232_p2 }
  0x2e   : > { %4242 = shalt.err (!%p4239_p3)
}
  0x2f   : > { %s4407_s14 = smov 128   ;;  %s4408_s13 = smov 8  }
  0x30   : > { %3711 = dma.hbm_to_vmem [thread:$0]  (!%p4548_p13), %s4981_s3, 8192, %s366_s25, [#allocation5], %s4407_s14, %s4407_s14, %s4408_s13  }
  0x31   : > { %s4409_s16 = smov [#allocation7]  }
  0x32   : > { %s393_s22 = sshll.u32 %s4409_s16, 4  ;;  %s394_s22 = int_to_ptr.vmem [resolvable:$true] %s393_s22 }
  0x33   : > { %s4254_s15 = scalar_lea.vmem %s394_s22, 512  ;;  %p4262_p10 = scmp.lt.s32.totalorder %s394_s22, %s394_s22 }
  0x34   : > { %p4255_p5 = scmp.ne.s32.totalorder %s394_s22, %s4254_s15  ;;  %p4263_p9 = scmp.lt.s32.totalorder %s4254_s15, %s4254_s15 }
  0x36   : > { %p4257_p7 = pnand %p4255_p5, %p4193_p0  ;;  %p4264_p12 = por %p4263_p9, %p4262_p10 }
  0x38   : > { %p4258_p8 = pneg %p4257_p7 }
  0x3a   : > { %p4265_p1 = pnand %p4264_p12, %p4258_p8 }
  0x3c   : > { %4268 = shalt.err (!%p4265_p1)
}
  0x3d   : > { %s4410_s30 = smov 64   ;;  %s4411_s21 = smov 4  }
  0x3e   : > { %3714 = dma.hbm_to_vmem [thread:$0]  (!%p4548_p13), %s4987_s9, 512, %s394_s22, [#allocation8], %s4410_s30, %s4410_s30, %s4411_s21  }
  0x3f   : > { %p3272_p2 = scmp.ge.s32.totalorder %s4369_s28, 2 }
  0x41   : > { %412 = sbr.rel (%p3272_p2) target bundleno = 105 (0x69), region = 64 }
  0x46   : > { %415 = sbr.rel (!%p4522_p4) target bundleno = 105 (0x69), region = 68  ;;  %s416_s19 = sand.u32 (%p4522_p4), 1, %s4365_s27  }
  0x47   : > { %s421_s25 = smul.u32 (%p4522_p4), 5, %s4369_s28  ;;  %s4586_s15 = scalar_lea.sflag (%p4522_p4), [#allocation3], %s416_s19 }
  0x48   : > { %s3688_s24 = smul.u32 (%p4522_p4), 200, %s416_s19 }
  0x49   : > { %s422_s14 = ssub.s32 (%p4522_p4), 9, %s421_s25 }
  0x4a   : > { %p423_p0 = scmp.lt.s32.totalorder (%p4522_p4), %s422_s14, 5  ;;  %s420_s22 = scalar_lea.vmem (%p4522_p4), [#allocation2], %s3688_s24 }
  0x4c   : > { %s5025_s14 = smov (!%p423_p0, %s422_s14), 5 }
  0x4d   : > { %s4583_s16 = smul.u32 640, %s5025_s14 }
  0x4f   : > { %s428_s23 = ssub.s32 3200, %s4583_s16 }
  0x50   : > { %429 = vsyncadd %s4586_s15, %s428_s23  ;;  %p3275_p4 = scmp.ne.s32.totalorder %s4583_s16, 0  ;;  %s3718_s17 = smul.u32 3200, %s4369_s28 }
  0x51   : > { %s435_s30 = sshll.u32 %s420_s22, 4  ;;  %s4273_s28 = scalar_lea.hbm %s4978_s0, 5760  ;;  %s4596_s30 = int_to_ptr.vmem [resolvable:$true] %s435_s30 }
  0x52   : > { %s4594_s13 = scalar_lea.hbm %s4978_s0, %s3718_s17 }
  0x53   : > { %s4269_s19 = scalar_lea.hbm %s4594_s13, %s4583_s16  ;;  %p4274_p5 = scmp.lt.s32.totalorder %s4594_s13, %s4978_s0 }
  0x54   : > { %p4270_p13 = scmp.ne.s32.totalorder %s4594_s13, %s4269_s19  ;;  %p4275_p7 = scmp.lt.s32.totalorder %s4273_s28, %s4269_s19 }
  0x56   : > { %p4271_p6 = pnand %p4270_p13, %p3275_p4  ;;  %p4276_p8 = por %p4275_p7, %p4274_p5 }
  0x58   : > { %p4272_p3 = pneg %p4271_p6 }
  0x5a   : > { %p4277_p10 = pnand %p4276_p8, %p4272_p3 }
  0x5c   : > { %4280 = shalt.err (!%p4277_p10)
}
  0x5d   : > { %s4281_s22 = scalar_lea.vmem %s4596_s30, %s4583_s16  ;;  %s4412_s17 = smov [#allocation2]  }
  0x5e   : > { %p4282_p9 = scmp.ne.s32.totalorder %s4596_s30, %s4281_s22  ;;  %s4285_s21 = sshll.u32 %s4412_s17, 4  ;;  %s4286_s21 = int_to_ptr.vmem [resolvable:$false] %s4285_s21 }
  0x5f   : > { %s4287_s12 = scalar_lea.vmem %s4286_s21, 6400  ;;  %p4288_p2 = scmp.lt.s32.totalorder %s4596_s30, %s4286_s21 }
  0x60   : > { %p4283_p12 = pnand %p4282_p9, %p3275_p4  ;;  %p4289_p0 = scmp.lt.s32.totalorder %s4287_s12, %s4281_s22 }
  0x62   : > { %p4284_p1 = pneg %p4283_p12  ;;  %p4290_p13 = por %p4289_p0, %p4288_p2 }
  0x64   : > { %p4291_p6 = pnand %p4290_p13, %p4284_p1 }
  0x66   : > { %4294 = shalt.err (!%p4291_p6)
}
  0x67   : > { %s4413_s19 = smov 640   ;;  %s4414_s25 = smov 40  }
  0x68   : > { %441 = dma.hbm_to_vmem [thread:$0]  (%p3275_p4), %s4594_s13, %s4583_s16, %s4596_s30, %s4586_s15, %s4413_s19, %s4413_s19, %s4414_s25  }
  0x69 PF: > { %447 = sbr.rel (%p4540_p11) target bundleno = 1565 (0x61d), region = 72  ;;  %s4625_s24 = sand.u32 (!%p4540_p11), 1, %s4361_s26  }
  0x6a   : > { %s3690_s28 = smul.u32 (!%p4540_p11), 200, %s4625_s24  ;;  %s450_s14 = scalar_lea.sflag (!%p4540_p11), [#allocation3], %s4625_s24 }
  0x6b   : > { %p5007_p3 = scmp.ne.s32.totalorder (!%p4540_p11), %s5002_s18, 0 }
  0x6c   : > { %s4629_s23 = scalar_lea.vmem (!%p4540_p11), [#allocation2], %s3690_s28 }
  0x6e   : > { %4344 = dma.done.wait (%p5007_p3), %s450_s14, 3200  }
  0x6f   : > { %4346 = vsyncadd (%p5007_p3), %s450_s14, 4294964096  ;;  %p5008_p4 = scmp.eq.s32.totalorder %s4507_s29, 0 }
  0x71   : > { %4348 = dma.done.wait (%p5008_p4), [#allocation5], 27392   ;;  %p5009_p11 = pmov %p5008_p4 }
  0x72   : > { %p5010_p5 = pmov %p5008_p4 }
  0x73   : > { %4350 = vsyncadd (%p5009_p11), [#allocation5], 4294939904 }
  0x74   : > { %4352 = dma.done.wait (%p5010_p5), [#allocation8], 512   ;;  %p5011_p7 = pmov %p5008_p4 }
  0x75   : > { %v3833_v0 = vld [vmem:[#allocation4 + $0xe4] ss:$16 sps:$4 sm:$0xff]   ;;  %v3837_v2 = vld [vmem:[#allocation4 + $0xe0] ss:$16 sps:$4 sm:$0xff]   ;;  %vm1491_vm0 = vcmask 1043456   ;;  %vm1481_vm1 = vcmask 719872  }
  0x76   : > { %4354 = vsyncadd (%p5011_p7), [#allocation8], 4294966784  ;;  %v3835_v1 = vld [vmem:[#allocation4 + $0x2e4] ss:$16 sps:$4 sm:$0xff]   ;;  %1504 = vmatprep.subr.bf16.mxu0 %v3833_v0  ;;  %v3838_v3 = vld [vmem:[#allocation4 + $0x2e0] ss:$16 sps:$4 sm:$0xff]  }
  0x77   : > { %1565 = vmatprep.subr.bf16.mxu1 %v3835_v1  ;;  %v3839_v4 = vld [vmem:[#allocation4 + $0xc4] ss:$16 sps:$4 sm:$0xff]   ;;  %1505 = vmatpush1.bf16.msra.mxu0 %v3837_v2  ;;  %v3843_v6 = vld [vmem:[#allocation4 + $0xc0] ss:$16 sps:$4 sm:$0xff]   ;;  %vm4417_vm2 = vmmov 0   ;;  %vm2809_vm3 = vcmask 523264  }
  0x78   : > { %1566 = vmatpush1.bf16.msra.mxu1 %v3838_v3  ;;  %v3841_v5 = vld [vmem:[#allocation4 + $0x2c4] ss:$16 sps:$4 sm:$0xff]   ;;  %1506 = vmatprep.subr.bf16.mxu0 %v3839_v4  ;;  %v3844_v7 = vld [vmem:[#allocation4 + $0x2c0] ss:$16 sps:$4 sm:$0xff]   ;;  %s3691_s22 = smul.u32 40, %s4625_s24  ;;  %s5012_s12 = sld [smem:[#allocation16_spill]] }
  0x79   : > { %1567 = vmatprep.subr.bf16.mxu1 %v3841_v5  ;;  %v3845_v8 = vld [vmem:[#allocation4 + $0xa4] ss:$16 sps:$4 sm:$0xff]   ;;  %v3849_v10 = vld [vmem:[#allocation4 + $0xa0] ss:$16 sps:$4 sm:$0xff]   ;;  %vm2987_vm4 = vcmask 15360   ;;  %s5013_s24 = sld [smem:[#allocation15_spill]] }
  0x7a   : > { %v3847_v9 = vld [vmem:[#allocation4 + $0x2a4] ss:$16 sps:$4 sm:$0xff]   ;;  %v3850_v11 = vld [vmem:[#allocation4 + $0x2a0] ss:$16 sps:$4 sm:$0xff]   ;;  %s4907_s19 = scalar_lea.vmem [#allocation9], %s3691_s22  }
  0x7b   : > { %1507 = vmatpush1.bf16.msra.mxu0 %v3843_v6  ;;  %v3851_v12 = vld [vmem:[#allocation4 + $0x84] ss:$16 sps:$4 sm:$0xff]   ;;  %v3855_v14 = vld [vmem:[#allocation4 + $0x80] ss:$16 sps:$4 sm:$0xff]  }
  0x7c   : > { %1568 = vmatpush1.bf16.msra.mxu1 %v3844_v7  ;;  %1508 = vmatprep.subr.bf16.mxu0 %v3845_v8  ;;  %v3853_v13 = vld [vmem:[#allocation4 + $0x284] ss:$16 sps:$4 sm:$0xff]   ;;  %v3856_v15 = vld [vmem:[#allocation4 + $0x280] ss:$16 sps:$4 sm:$0xff]  }
  0x7d   : > { %1569 = vmatprep.subr.bf16.mxu1 %v3847_v9  ;;  %v3857_v16 = vld [vmem:[#allocation4 + $0x64] ss:$16 sps:$4 sm:$0xff]   ;;  %v3861_v18 = vld [vmem:[#allocation4 + $0x60] ss:$16 sps:$4 sm:$0xff]  }
  0x7e   : > { %v3859_v17 = vld [vmem:[#allocation4 + $0x264] ss:$16 sps:$4 sm:$0xff]   ;;  %v3862_v19 = vld [vmem:[#allocation4 + $0x260] ss:$16 sps:$4 sm:$0xff]  }
  0x7f   : > { %1509 = vmatpush1.bf16.msra.mxu0 %v3849_v10  ;;  %v3863_v20 = vld [vmem:[#allocation4 + $0x44] ss:$16 sps:$4 sm:$0xff]   ;;  %v3867_v22 = vld [vmem:[#allocation4 + $0x40] ss:$16 sps:$4 sm:$0xff]   ;;  %p5014_p8 = scmp.ne.s32.totalorder %s5013_s24, 0 }
  0x80   : > { %1570 = vmatpush1.bf16.msra.mxu1 %v3850_v11  ;;  %1510 = vmatprep.subr.bf16.mxu0 %v3851_v12  ;;  %v3865_v21 = vld [vmem:[#allocation4 + $0x244] ss:$16 sps:$4 sm:$0xff]   ;;  %v3868_v23 = vld [vmem:[#allocation4 + $0x240] ss:$16 sps:$4 sm:$0xff]   ;;  %v3932_v12 = vld [vmem:[#allocation4 + $0xec] ss:$16 sps:$4 sm:$0xff]  }
  0x81   : > { %1571 = vmatprep.subr.bf16.mxu1 %v3853_v13  ;;  %v3869_v24 = vld [vmem:[#allocation4 + $0x24] ss:$16 sps:$4 sm:$0xff]   ;;  %v3873_v26 = vld [vmem:[#allocation4 + $0x20] ss:$16 sps:$4 sm:$0xff]   ;;  %s3000_s25 = smul.u32 (%p5014_p8), 5, %s4507_s29  ;;  %s5015_s20 = sld [smem:[#allocation17_spill]] (%p5014_p8) }
  0x82   : > { %v3871_v25 = vld [vmem:[#allocation4 + $0x224] ss:$16 sps:$4 sm:$0xff]   ;;  %v3874_v27 = vld [vmem:[#allocation4 + $0x220] ss:$16 sps:$4 sm:$0xff]   ;;  %s3560_s28 = smul.u32 (%p5014_p8), 40, %s4507_s29 }
  0x83   : > { %1511 = vmatpush1.bf16.msra.mxu0 %v3855_v14  ;;  %v3875_v28 = vld [vmem:[#allocation4 + $0x4] ss:$16 sps:$4 sm:$0xff]   ;;  %v3879_v30 = vld [vmem:[#allocation4] ss:$16 sps:$4 sm:$0xff]   ;;  %s3001_s14 = ssub.s32 (%p5014_p8), 9, %s3000_s25 }
  0x84   : > { %1572 = vmatpush1.bf16.msra.mxu1 %v3856_v15  ;;  %1512 = vmatprep.subr.bf16.mxu0 %v3857_v16  ;;  %v3877_v29 = vld [vmem:[#allocation4 + $0x204] ss:$16 sps:$4 sm:$0xff]   ;;  %v3880_v31 = vld [vmem:[#allocation4 + $0x200] ss:$16 sps:$4 sm:$0xff]   ;;  %p3002_p10 = scmp.lt.s32.totalorder (%p5014_p8), %s3001_s14, 5 }
  0x85   : > { %1573 = vmatprep.subr.bf16.mxu1 %v3859_v17  ;;  %v3881_v32 = vld [vmem:[#allocation4 + $0x1e4] ss:$16 sps:$4 sm:$0xff]   ;;  %v3885_v34 = vld [vmem:[#allocation4 + $0x1e0] ss:$16 sps:$4 sm:$0xff]  }
  0x86   : > { %v3883_v33 = vld [vmem:[#allocation4 + $0x3e4] ss:$16 sps:$4 sm:$0xff]   ;;  %v3886_v35 = vld [vmem:[#allocation4 + $0x3e0] ss:$16 sps:$4 sm:$0xff]  }
  0x87   : > { %1513 = vmatpush1.bf16.msra.mxu0 %v3861_v18  ;;  %v3887_v36 = vld [vmem:[#allocation4 + $0x1c4] ss:$16 sps:$4 sm:$0xff]   ;;  %v3891_v38 = vld [vmem:[#allocation4 + $0x1c0] ss:$16 sps:$4 sm:$0xff]   ;;  %s4926_s16 = scalar_lea.vmem (%p5014_p8), %s5015_s20, %s3560_s28  }
  0x88   : > { %1574 = vmatpush1.bf16.msra.mxu1 %v3862_v19  ;;  %1514 = vmatprep.subr.bf16.mxu0 %v3863_v20  ;;  %v3889_v37 = vld [vmem:[#allocation4 + $0x3c4] ss:$16 sps:$4 sm:$0xff]   ;;  %v3892_v39 = vld [vmem:[#allocation4 + $0x3c0] ss:$16 sps:$4 sm:$0xff]   ;;  %v3930_v20 = vld [vmem:[#allocation4 + $0xe8] ss:$16 sps:$4 sm:$0xff]  }
  0x89   : > { %1575 = vmatprep.subr.bf16.mxu1 %v3865_v21  ;;  %v3893_v40 = vld [vmem:[#allocation4 + $0x1a4] ss:$16 sps:$4 sm:$0xff]   ;;  %v3897_v42 = vld [vmem:[#allocation4 + $0x1a0] ss:$16 sps:$4 sm:$0xff]  }
  0x8a   : > { %v3895_v41 = vld [vmem:[#allocation4 + $0x3a4] ss:$16 sps:$4 sm:$0xff]   ;;  %v3898_v43 = vld [vmem:[#allocation4 + $0x3a0] ss:$16 sps:$4 sm:$0xff]  }
  0x8b   : > { %1515 = vmatpush1.bf16.msra.mxu0 %v3867_v22  ;;  %v3899_v44 = vld [vmem:[#allocation4 + $0x184] ss:$16 sps:$4 sm:$0xff]   ;;  %v3903_v50 = vld [vmem:[#allocation4 + $0x180] ss:$16 sps:$4 sm:$0xff]  }
  0x8c   : > { %1576 = vmatpush1.bf16.msra.mxu1 %v3868_v23  ;;  %1516 = vmatprep.subr.bf16.mxu0 %v3869_v24  ;;  %v3901_v45 = vld [vmem:[#allocation4 + $0x384] ss:$16 sps:$4 sm:$0xff]   ;;  %v3904_v51 = vld [vmem:[#allocation4 + $0x380] ss:$16 sps:$4 sm:$0xff]   ;;  %v3939_v23 = vld [vmem:[#allocation4 + $0xcc] ss:$16 sps:$4 sm:$0xff]  }
  0x8d   : > { %1577 = vmatprep.subr.bf16.mxu1 %v3871_v25  ;;  %v520_v46 = vld [vmem:[%s4629_s23 + $0x8] sm:$0xff]  ;;  %v525_v47 = vld [vmem:[%s4629_s23 + $0x30] sm:$0xff]  ;;  %v522_v48 = vld [vmem:[%s4629_s23 + $0x18] sm:$0xff] }
  0x8e   : > { %v527_v49 = vld [vmem:[%s4629_s23 + $0x40] sm:$0xff]  ;;  %v4647_v52 = vpack.c.bf16 %v525_v47, %v520_v46  ;;  %v707_v6 = vld [vmem:[#allocation4 + $0x4a0] sm:$0xff]  ;;  %v526_v10 = vld [vmem:[%s4629_s23 + $0x38] sm:$0xff] }
  0x8f   : > { %1517 = vmatpush1.bf16.msra.mxu0 %v3873_v26  ;;  %v4649_v53 = vpack.c.bf16 %v527_v49, %v522_v48  ;;  %v3905_v54 = vld [vmem:[#allocation4 + $0x164] ss:$16 sps:$4 sm:$0xff]   ;;  %v3909_v56 = vld [vmem:[#allocation4 + $0x160] ss:$16 sps:$4 sm:$0xff]   ;;  %v3431_v11 = vcombine.high %v707_v6, %v707_v6  ;;  %v3430_v13 = vcombine.low %v707_v6, %v707_v6  ;;  %v3937_v25 = vld [vmem:[#allocation4 + $0xc8] ss:$16 sps:$4 sm:$0xff]  }
  0x90   : > { %1578 = vmatpush1.bf16.msra.mxu1 %v3874_v27  ;;  %1518 = vmatprep.subr.bf16.mxu0 %v3875_v28  ;;  %v3907_v55 = vld [vmem:[#allocation4 + $0x364] ss:$16 sps:$4 sm:$0xff]   ;;  %v3910_v57 = vld [vmem:[#allocation4 + $0x360] ss:$16 sps:$4 sm:$0xff]   ;;  %v3957_v49 = vld [vmem:[#allocation4 + $0x6c] ss:$16 sps:$4 sm:$0xff]  }
  0x91   : > { %1579 = vmatprep.subr.bf16.mxu1 %v3877_v29  ;;  %1536 = vmatprep.mubr.bf16.mxu0 %v4647_v52  ;;  %v3911_v58 = vld [vmem:[#allocation4 + $0x144] ss:$16 sps:$4 sm:$0xff]   ;;  %v3915_v60 = vld [vmem:[#allocation4 + $0x140] ss:$16 sps:$4 sm:$0xff]   ;;  %v1493_v22 = vsel %vm1491_vm0, %v3430_v13, 0 }
  0x92   : > { %1597 = vmatprep.mubr.bf16.mxu1 %v4649_v53  ;;  %v3913_v59 = vld [vmem:[#allocation4 + $0x344] ss:$16 sps:$4 sm:$0xff]   ;;  %v3916_v61 = vld [vmem:[#allocation4 + $0x340] ss:$16 sps:$4 sm:$0xff]   ;;  %v3970_v6 = vld [vmem:[#allocation4 + $0x8] ss:$16 sps:$4 sm:$0xff]  }
  0x93   : > { %1519 = vmatpush1.bf16.msra.mxu0 %v3879_v30  ;;  %v3917_v62 = vld [vmem:[#allocation4 + $0x124] ss:$16 sps:$4 sm:$0xff]   ;;  %v3921_v0 = vld [vmem:[#allocation4 + $0x120] ss:$16 sps:$4 sm:$0xff]   ;;  %v3979_v13 = vld [vmem:[#allocation4 + $0x2a8] ss:$16 sps:$4 sm:$0xff]  }
  0x94   : > { %1580 = vmatpush1.bf16.msra.mxu1 %v3880_v31  ;;  %1520 = vmatprep.subr.bf16.mxu0 %v3881_v32  ;;  %v3919_v63 = vld [vmem:[#allocation4 + $0x324] ss:$16 sps:$4 sm:$0xff]   ;;  %v3922_v1 = vld [vmem:[#allocation4 + $0x320] ss:$16 sps:$4 sm:$0xff]  }
  0x95   : > { %1581 = vmatprep.subr.bf16.mxu1 %v3883_v33  ;;  %v3923_v2 = vld [vmem:[#allocation4 + $0x104] ss:$16 sps:$4 sm:$0xff]   ;;  %v3927_v4 = vld [vmem:[#allocation4 + $0x100] ss:$16 sps:$4 sm:$0xff]   ;;  %v3945_v33 = vld [vmem:[#allocation4 + $0xac] ss:$16 sps:$4 sm:$0xff]  }
  0x96   : > { %v3925_v3 = vld [vmem:[#allocation4 + $0x304] ss:$16 sps:$4 sm:$0xff]   ;;  %v3928_v5 = vld [vmem:[#allocation4 + $0x300] ss:$16 sps:$4 sm:$0xff]  }
  0x97   : > { %1521 = vmatpush2.bf16.msra.mxu0 %v3885_v34  ;;  %v519_v7 = vld [vmem:[%s4629_s23] sm:$0xff]  ;;  %v524_v8 = vld [vmem:[%s4629_s23 + $0x28] sm:$0xff]  ;;  %v521_v9 = vld [vmem:[%s4629_s23 + $0x10] sm:$0xff] }
  0x98   : > { %1582 = vmatpush2.bf16.msra.mxu1 %v3886_v35  ;;  %1522 = vmatprep.subr.bf16.mxu0 %v3887_v36  ;;  %v530_v14 = vld [vmem:[%s4629_s23 + $0x58] sm:$0xff]  ;;  %v535_v15 = vld [vmem:[%s4629_s23 + $0x80] sm:$0xff]  ;;  %v532_v16 = vld [vmem:[%s4629_s23 + $0x68] sm:$0xff]  ;;  %v4660_v17 = vpack.c.bf16 %v524_v8, %v519_v7  ;;  %v4662_v18 = vpack.c.bf16 %v526_v10, %v521_v9 }
  0x99   : > { %1583 = vmatprep.subr.bf16.mxu1 %v3889_v37  ;;  %v537_v19 = vld [vmem:[%s4629_s23 + $0x90] sm:$0xff]  ;;  %v4667_v26 = vpack.c.bf16 %v535_v15, %v530_v14  ;;  %v534_v29 = vld [vmem:[%s4629_s23 + $0x78] sm:$0xff]  ;;  %v531_v31 = vld [vmem:[%s4629_s23 + $0x60] sm:$0xff] }
  0x9a   : > { %v3936_v21 = vld [vmem:[#allocation4 + $0x484] ss:$16 sps:$4 sm:$0xff]   ;;  %v3934_v24 = vld [vmem:[#allocation4 + $0x480] ss:$16 sps:$4 sm:$0xff]   ;;  %v4670_v28 = vpack.c.bf16 %v537_v19, %v532_v16  ;;  %v3973_v7 = vld [vmem:[#allocation4 + $0x2c8] ss:$16 sps:$4 sm:$0xff]  }
  0x9b   : > { %1523 = vmatpush2.bf16.msra.mxu0 %v3891_v38  ;;  %v529_v27 = vld [vmem:[%s4629_s23 + $0x50] sm:$0xff]  ;;  %v536_v32 = vld [vmem:[%s4629_s23 + $0x88] sm:$0xff]  ;;  %v542_v38 = vld [vmem:[%s4629_s23 + $0xb8] sm:$0xff] }
  0x9c   : > { %1584 = vmatpush2.bf16.msra.mxu1 %v3892_v39  ;;  %1524 = vmatprep.subr.bf16.mxu0 %v3893_v40  ;;  %v3942_v30 = vld [vmem:[#allocation4 + $0x464] ss:$16 sps:$4 sm:$0xff]   ;;  %v3940_v34 = vld [vmem:[#allocation4 + $0x460] ss:$16 sps:$4 sm:$0xff]   ;;  %v4680_v36 = vpack.c.bf16 %v534_v29, %v529_v27  ;;  %v4682_v37 = vpack.c.bf16 %v536_v32, %v531_v31  ;;  %v3943_v39 = vld [vmem:[#allocation4 + $0xa8] ss:$16 sps:$4 sm:$0xff]  }
  0x9d   : > { %1585 = vmatprep.subr.bf16.mxu1 %v3895_v41  ;;  %v540_v35 = vld [vmem:[%s4629_s23 + $0xa8] sm:$0xff]  ;;  %v539_v46 = vld [vmem:[%s4629_s23 + $0xa0] sm:$0xff]  ;;  %v541_v47 = vld [vmem:[%s4629_s23 + $0xb0] sm:$0xff] }
  0x9e   : > { %v3948_v40 = vld [vmem:[#allocation4 + $0x444] ss:$16 sps:$4 sm:$0xff]   ;;  %v3951_v41 = vld [vmem:[#allocation4 + $0x8c] ss:$16 sps:$4 sm:$0xff]   ;;  %v3982_v16 = vld [vmem:[#allocation4 + $0x1c8] ss:$16 sps:$4 sm:$0xff]  }
  0x9f   : > { %1525 = vmatpush2.bf16.msra.mxu0 %v3897_v42  ;;  %v3946_v42 = vld [vmem:[#allocation4 + $0x440] ss:$16 sps:$4 sm:$0xff]   ;;  %v3954_v48 = vld [vmem:[#allocation4 + $0x424] ss:$16 sps:$4 sm:$0xff]   ;;  %v3978_v9 = vld [vmem:[#allocation4 + $0x1ec] ss:$16 sps:$4 sm:$0xff]  }
  0xa0   : > { %1586 = vmatpush2.bf16.msra.mxu1 %v3898_v43  ;;  %1526 = vmatprep.subr.bf16.mxu0 %v3899_v44  ;;  %v4685_v43 = vpack.c.bf16 %v540_v35, %v540_v35  ;;  %v4687_v44 = vpack.c.bf16 %v542_v38, %v542_v38  ;;  %v538_v8 = vld [vmem:[%s4629_s23 + $0x98] sm:$0xff] }
  0xa1   : > { %1587 = vmatprep.subr.bf16.mxu1 %v3901_v45  ;;  %v3949_v45 = vld [vmem:[#allocation4 + $0x88] ss:$16 sps:$4 sm:$0xff]   ;;  %v3981_v10 = vld [vmem:[#allocation4 + $0x2ac] ss:$16 sps:$4 sm:$0xff]  }
  0xa2   : > { %v3984_v14 = vld [vmem:[#allocation4 + $0x1cc] ss:$16 sps:$4 sm:$0xff]   ;;  %v3985_v19 = vld [vmem:[#allocation4 + $0x288] ss:$16 sps:$4 sm:$0xff]  }
  0xa3   : > { %1527 = vmatpush2.bf16.msra.mxu0 %v3903_v50  ;;  %v4695_v50 = vpack.c.bf16 %v539_v46, %v539_v46  ;;  %v3987_v15 = vld [vmem:[#allocation4 + $0x28c] ss:$16 sps:$4 sm:$0xff]   ;;  %v3997_v31 = vld [vmem:[#allocation4 + $0x248] ss:$16 sps:$4 sm:$0xff]  }
  0xa4   : > { %1588 = vmatpush2.bf16.msra.mxu1 %v3904_v51  ;;  %1528 = vmatprep.subr.bf16.mxu0 %v3905_v54  ;;  %v4697_v51 = vpack.c.bf16 %v541_v47, %v541_v47  ;;  %v3952_v54 = vld [vmem:[#allocation4 + $0x420] ss:$16 sps:$4 sm:$0xff]   ;;  %v3996_v27 = vld [vmem:[#allocation4 + $0x18c] ss:$16 sps:$4 sm:$0xff]   ;;  %v4003_v35 = vld [vmem:[#allocation4 + $0x228] ss:$16 sps:$4 sm:$0xff]  }
  0xa5   : > { %1589 = vmatprep.subr.bf16.mxu1 %v3907_v55  ;;  %v3955_v55 = vld [vmem:[#allocation4 + $0x68] ss:$16 sps:$4 sm:$0xff]   ;;  %v3999_v29 = vld [vmem:[#allocation4 + $0x24c] ss:$16 sps:$4 sm:$0xff]  }
  0xa6   : > { %v4002_v32 = vld [vmem:[#allocation4 + $0x16c] ss:$16 sps:$4 sm:$0xff]   ;;  %v4012_v46 = vld [vmem:[#allocation4 + $0x128] ss:$16 sps:$4 sm:$0xff]  }
  0xa7   : > { %1529 = vmatpush2.bf16.msra.mxu0 %v3909_v56  ;;  %v3960_v56 = vld [vmem:[#allocation4 + $0x404] ss:$16 sps:$4 sm:$0xff]   ;;  %v4008_v38 = vld [vmem:[#allocation4 + $0x14c] ss:$16 sps:$4 sm:$0xff]   ;;  %v4015_v47 = vld [vmem:[#allocation4 + $0x3e8] ss:$16 sps:$4 sm:$0xff]  }
  0xa8   : > { %1590 = vmatpush2.bf16.msra.mxu1 %v3910_v57  ;;  %1530 = vmatprep.subr.bf16.mxu0 %v3911_v58  ;;  %v3963_v57 = vld [vmem:[#allocation4 + $0x4c] ss:$16 sps:$4 sm:$0xff]   ;;  %v3958_v58 = vld [vmem:[#allocation4 + $0x400] ss:$16 sps:$4 sm:$0xff]  }
  0xa9   : > { %1591 = vmatprep.subr.bf16.mxu1 %v3913_v59  ;;  %v3961_v59 = vld [vmem:[#allocation4 + $0x48] ss:$16 sps:$4 sm:$0xff]  }
  0xab   : > { %1531 = vmatpush2.bf16.msra.mxu0 %v3915_v60  ;;  %v523_v60 = vld [vmem:[%s4629_s23 + $0x20] sm:$0xff] }
  0xac   : > { %1592 = vmatpush2.bf16.msra.mxu1 %v3916_v61  ;;  %1532 = vmatprep.subr.bf16.mxu0 %v3917_v62  ;;  %v528_v61 = vld [vmem:[%s4629_s23 + $0x48] sm:$0xff] }
  0xad   : > { %1593 = vmatprep.subr.bf16.mxu1 %v3919_v63  ;;  %v3966_v62 = vld [vmem:[#allocation4 + $0x2c] ss:$16 sps:$4 sm:$0xff]  }
  0xae   : > { %v3969_v63 = vld [vmem:[#allocation4 + $0x2ec] ss:$16 sps:$4 sm:$0xff]  }
  0xaf   : > { %1533 = vmatpush2.bf16.msra.mxu0 %v3921_v0  ;;  %v4415_v0 = vmov 0  }
  0xb0   : > { %1594 = vmatpush2.bf16.msra.mxu1 %v3922_v1  ;;  %1534 = vmatprep.subr.bf16.mxu0 %v3923_v2  ;;  %v4705_v1 = vpack.c.bf16 %v528_v61, %v523_v60  ;;  %v3964_v2 = vld [vmem:[#allocation4 + $0x28] ss:$16 sps:$4 sm:$0xff]   ;;  %v4031_v60 = vld [vmem:[#allocation4 + $0x38c] ss:$16 sps:$4 sm:$0xff]  }
  0xb1   : > { %1595 = vmatprep.subr.bf16.mxu1 %v3925_v3  ;;  %v3967_v3 = vld [vmem:[#allocation4 + $0x2e8] ss:$16 sps:$4 sm:$0xff]   ;;  %v4034_v61 = vld [vmem:[#allocation4 + $0x48c] ss:$16 sps:$4 sm:$0xff]  }
  0xb3   : > { %1535 = vmatpush2.bf16.msra.mxu0 %v3927_v4  ;;  %v3972_v4 = vld [vmem:[#allocation4 + $0xc] ss:$16 sps:$4 sm:$0xff]  }
  0xb4   : > { %1596 = vmatpush2.bf16.msra.mxu1 %v3928_v5  ;;  %3434 = vmatprep.subr.msk.bf16.mxu0 %vm1491_vm0, %v3431_v11  ;;  %v3975_v5 = vld [vmem:[#allocation4 + $0x2cc] ss:$16 sps:$4 sm:$0xff]  }
  0xb5   : > { %1687 = vmatprep.subr.bf16.mxu1 %v3932_v12  ;;  %v3976_v12 = vld [vmem:[#allocation4 + $0x1e8] ss:$16 sps:$4 sm:$0xff]  }
  0xb6   : > { %1537 = vmatmul.mubr.bf16.vlgmr.msra.gmra.mxu0 %v4660_v17 }
  0xb7   : > { %1598 = vmatmul.mubr.bf16.vlgmr.msra.gmra.mxu1 %v4662_v18  ;;  %1631 = vmatpush1.bf16.msra.mxu0 %v1493_v22  ;;  %v3993_v22 = vld [vmem:[#allocation4 + $0x26c] ss:$16 sps:$4 sm:$0xff]  }
  0xb8   : > { %1688 = vmatpush1.bf16.msra.mxu1 %v3930_v20  ;;  %1632 = vmatprep.subr.bf16.mxu0 %v3936_v21  ;;  %v543_v20 = vld [vmem:[%s4629_s23 + $0xc0] sm:$0xff] }
  0xb9   : > { %1689 = vmatprep.subr.bf16.mxu1 %v3939_v23  ;;  %1546 = vmatprep.mubr.bf16.mxu0 %v4667_v26  ;;  %v3990_v21 = vld [vmem:[#allocation4 + $0x1ac] ss:$16 sps:$4 sm:$0xff]   ;;  %v4718_v23 = vpack.c.bf16 %v543_v20, %v543_v20  ;;  %v4062_v20 = vld [vmem:[#allocation6 + $0x60] ss:$8 sps:$4 sm:$0xff]  }
  0xba   : > { %1607 = vmatprep.mubr.bf16.mxu1 %v4670_v28 }
  0xbb   : > { %1633 = vmatpush1.bf16.msra.mxu0 %v3934_v24  ;;  %v3988_v24 = vld [vmem:[#allocation4 + $0x1a8] ss:$16 sps:$4 sm:$0xff]  }
  0xbc   : > { %1690 = vmatpush1.bf16.msra.mxu1 %v3937_v25  ;;  %1634 = vmatprep.subr.bf16.mxu0 %v3942_v30  ;;  %v3991_v25 = vld [vmem:[#allocation4 + $0x268] ss:$16 sps:$4 sm:$0xff]  }
  0xbd   : > { %1691 = vmatprep.subr.bf16.mxu1 %v3945_v33  ;;  %v3994_v30 = vld [vmem:[#allocation4 + $0x188] ss:$16 sps:$4 sm:$0xff]   ;;  %v4005_v33 = vld [vmem:[#allocation4 + $0x22c] ss:$16 sps:$4 sm:$0xff]  }
  0xbe   : > { %1547 = vmatmul.mubr.bf16.gmra.mxu0 %v4680_v36 }
  0xbf   : > { %1608 = vmatmul.mubr.bf16.gmra.mxu1 %v4682_v37  ;;  %1635 = vmatpush1.bf16.msra.mxu0 %v3940_v34  ;;  %v4000_v34 = vld [vmem:[#allocation4 + $0x168] ss:$16 sps:$4 sm:$0xff]  }
  0xc0   : > { %1692 = vmatpush1.bf16.msra.mxu1 %v3943_v39  ;;  %1636 = vmatprep.subr.bf16.mxu0 %v3948_v40  ;;  %v4011_v39 = vld [vmem:[#allocation4 + $0x20c] ss:$16 sps:$4 sm:$0xff]   ;;  %v4006_v40 = vld [vmem:[#allocation4 + $0x148] ss:$16 sps:$4 sm:$0xff]  }
  0xc1   : > { %1693 = vmatprep.subr.bf16.mxu1 %v3951_v41  ;;  %1556 = vmatprep.mubr.bf16.mxu0 %v4685_v43  ;;  %v4009_v41 = vld [vmem:[#allocation4 + $0x208] ss:$16 sps:$4 sm:$0xff]  }
  0xc2   : > { %1617 = vmatprep.mubr.bf16.mxu1 %v4687_v44 }
  0xc3   : > { %1637 = vmatpush1.bf16.msra.mxu0 %v3946_v42  ;;  %v4014_v42 = vld [vmem:[#allocation4 + $0x12c] ss:$16 sps:$4 sm:$0xff]  }
  0xc4   : > { %1694 = vmatpush1.bf16.msra.mxu1 %v3949_v45  ;;  %1638 = vmatprep.subr.bf16.mxu0 %v3954_v48  ;;  %v4017_v45 = vld [vmem:[#allocation4 + $0x3ec] ss:$16 sps:$4 sm:$0xff]  }
  0xc5   : > { %1695 = vmatprep.subr.bf16.mxu1 %v3957_v49  ;;  %v4020_v48 = vld [vmem:[#allocation4 + $0x10c] ss:$16 sps:$4 sm:$0xff]  }
  0xc6   : > { %1557 = vmatmul.mubr.bf16.gmra.mxu0 %v4695_v50  ;;  %v708_v49 = vld [vmem:[#allocation4 + $0x4a8] sm:$0xff] }
  0xc7   : > { %1618 = vmatmul.mubr.bf16.gmra.mxu1 %v4697_v51  ;;  %1639 = vmatpush1.bf16.msra.mxu0 %v3952_v54  ;;  %v4018_v54 = vld [vmem:[#allocation4 + $0x108] ss:$16 sps:$4 sm:$0xff]  }
  0xc8   : > { %1696 = vmatpush1.bf16.msra.mxu1 %v3955_v55  ;;  %1640 = vmatprep.subr.bf16.mxu0 %v3960_v56  ;;  %v4021_v55 = vld [vmem:[#allocation4 + $0x3c8] ss:$16 sps:$4 sm:$0xff]   ;;  %v4026_v56 = vld [vmem:[#allocation4 + $0x3ac] ss:$16 sps:$4 sm:$0xff]  }
  0xc9   : > { %1697 = vmatprep.subr.bf16.mxu1 %v3963_v57  ;;  %1658 = vmatprep.mubr.bf16.mxu0 %v4415_v0  ;;  %v3433_v57 = vcombine.high %v708_v49, %v708_v49 }
  0xca   : > { %1719 = vmatprep.mubr.bf16.mxu1 %v4647_v52  ;;  %v533_v52 = vld [vmem:[%s4629_s23 + $0x70] sm:$0xff] }
  0xcb   : > { %1641 = vmatpush1.bf16.msra.mxu0 %v3958_v58  ;;  %v4712_v11 = vpack.c.bf16 %v538_v8, %v533_v52  ;;  %v3432_v58 = vcombine.low %v708_v49, %v708_v49  ;;  %v4046_v52 = vld [vmem:[#allocation4 + $0x44c] ss:$16 sps:$4 sm:$0xff]   ;;  %v4041_v8 = vld [vmem:[#allocation4 + $0x348] ss:$16 sps:$4 sm:$0xff]  }
  0xcc   : > { %1698 = vmatpush1.bf16.msra.mxu1 %v3961_v59  ;;  %1748 = vmatprep.subr.bf16.mxu0 %v3969_v63  ;;  %v4024_v59 = vld [vmem:[#allocation4 + $0x3a8] ss:$16 sps:$4 sm:$0xff]  }
  0xcd   : > { %1699 = vmatprep.subr.bf16.mxu1 %v3966_v62  ;;  %v1499_v62 = vsel %vm1491_vm0, %v3432_v58, 0  ;;  %v4029_v63 = vld [vmem:[#allocation4 + $0x388] ss:$16 sps:$4 sm:$0xff]  }
  0xce   : > { %3435 = vmatmul.mubr.msk.bf16.vlgmr.msra.gmra.mxu0 %vm1481_vm1, %v4705_v1  ;;  %v4125_v49 = vld [vmem:[#allocation6 + $0x110] ss:$8 sps:$4 sm:$0xff]  }
  0xcf   : > { %1749 = vmatpush1.bf16.msra.mxu0 %v3967_v3  ;;  %1668 = vmatprep.mubr.bf16.mxu0 %v4415_v0  ;;  %v4037_v3 = vld [vmem:[#allocation4 + $0x36c] ss:$16 sps:$4 sm:$0xff]   ;;  %v4095_v58 = vld [vmem:[#allocation6 + $0xb0] ss:$8 sps:$4 sm:$0xff]  }
  0xd0   : > { %1700 = vmatpush1.bf16.msra.mxu1 %v3964_v2  ;;  %1750 = vmatprep.subr.bf16.mxu0 %v3975_v5  ;;  %v4032_v2 = vld [vmem:[#allocation4 + $0x488] ss:$16 sps:$4 sm:$0xff]  }
  0xd1   : > { %1701 = vmatprep.subr.bf16.mxu1 %v3972_v4  ;;  %v4040_v4 = vld [vmem:[#allocation4 + $0x46c] ss:$16 sps:$4 sm:$0xff]   ;;  %v4035_v5 = vld [vmem:[#allocation4 + $0x368] ss:$16 sps:$4 sm:$0xff]  }
  0xd3   : > { %1751 = vmatpush1.bf16.msra.mxu0 %v3973_v7  ;;  %v4043_v7 = vld [vmem:[#allocation4 + $0x34c] ss:$16 sps:$4 sm:$0xff]  }
  0xd4   : > { %1702 = vmatpush1.bf16.msra.mxu1 %v3970_v6  ;;  %1752 = vmatprep.subr.bf16.mxu0 %v3981_v10  ;;  %v4038_v6 = vld [vmem:[#allocation4 + $0x468] ss:$16 sps:$4 sm:$0xff]   ;;  %v4052_v10 = vld [vmem:[#allocation4 + $0x42c] ss:$16 sps:$4 sm:$0xff]  }
  0xd5   : > { %1703 = vmatprep.subr.bf16.mxu1 %v3978_v9  ;;  %v4044_v9 = vld [vmem:[#allocation4 + $0x448] ss:$16 sps:$4 sm:$0xff]  }
  0xd6   : > { %3436 = vmatmul.mubr.msk.bf16.gmra.mxu0 %vm1481_vm1, %v4712_v11 }
  0xd7   : > { %1753 = vmatpush1.bf16.msra.mxu0 %v3979_v13  ;;  %1678 = vmatprep.mubr.bf16.mxu0 %v4415_v0  ;;  %v4055_v13 = vld [vmem:[#allocation4 + $0x30c] ss:$16 sps:$4 sm:$0xff]  }
  0xd8   : > { %1704 = vmatpush2.bf16.msra.mxu1 %v3976_v12  ;;  %1754 = vmatprep.subr.bf16.mxu0 %v3987_v15  ;;  %v4050_v12 = vld [vmem:[#allocation4 + $0x428] ss:$16 sps:$4 sm:$0xff]  }
  0xd9   : > { %1705 = vmatprep.subr.bf16.mxu1 %v3984_v14  ;;  %v4058_v14 = vld [vmem:[#allocation4 + $0x40c] ss:$16 sps:$4 sm:$0xff]   ;;  %v4053_v15 = vld [vmem:[#allocation4 + $0x308] ss:$16 sps:$4 sm:$0xff]  }
  0xdb   : > { %1755 = vmatpush1.bf16.msra.mxu0 %v3985_v19  ;;  %v4064_v19 = vld [vmem:[#allocation6 + $0x64] ss:$8 sps:$4 sm:$0xff]  }
  0xdc   : > { %1706 = vmatpush2.bf16.msra.mxu1 %v3982_v16  ;;  %1756 = vmatprep.subr.bf16.mxu0 %v3993_v22  ;;  %v4061_v16 = vld [vmem:[#allocation6 + $0x74] ss:$8 sps:$4 sm:$0xff]   ;;  %v4070_v22 = vld [vmem:[#allocation6 + $0x44] ss:$8 sps:$4 sm:$0xff]  }
  0xdd   : > { %1707 = vmatprep.subr.bf16.mxu1 %v3990_v21  ;;  %v4065_v21 = vld [vmem:[#allocation6 + $0x50] ss:$8 sps:$4 sm:$0xff]  }
  0xde   : > { %3437 = vmatmul.mubr.msk.bf16.gmra.mxu0 %vm1481_vm1, %v4718_v23 }
  0xdf   : > { %1757 = vmatpush1.bf16.msra.mxu0 %v3991_v25  ;;  %1780 = vmatprep.mubr.bf16.mxu0 %v4649_v53  ;;  %v4023_v53 = vld [vmem:[#allocation4 + $0x3cc] ss:$16 sps:$4 sm:$0xff]  }
  0xe0   : > { %1708 = vmatpush2.bf16.msra.mxu1 %v3988_v24  ;;  %1758 = vmatprep.subr.bf16.mxu0 %v3999_v29  ;;  %v4109_v24 = vld [vmem:[#allocation6 + $0x174] ss:$8 sps:$4 sm:$0xff]   ;;  %v4076_v25 = vld [vmem:[#allocation6 + $0x24] ss:$8 sps:$4 sm:$0xff]   ;;  %v4077_v29 = vld [vmem:[#allocation6 + $0x10] ss:$8 sps:$4 sm:$0xff]  }
  0xe1   : > { %1709 = vmatprep.subr.bf16.mxu1 %v3996_v27  ;;  %v4107_v27 = vld [vmem:[#allocation6 + $0x170] ss:$8 sps:$4 sm:$0xff]  }
  0xe3   : > { %1759 = vmatpush1.bf16.msra.mxu0 %v3997_v31  ;;  %v4082_v31 = vld [vmem:[#allocation6 + $0x4] ss:$8 sps:$4 sm:$0xff]  }
  0xe4   : > { %1710 = vmatpush2.bf16.msra.mxu1 %v3994_v30  ;;  %1760 = vmatprep.subr.bf16.mxu0 %v4005_v33  ;;  %v4115_v30 = vld [vmem:[#allocation6 + $0x154] ss:$8 sps:$4 sm:$0xff]   ;;  %v4116_v33 = vld [vmem:[#allocation6 + $0x140] ss:$8 sps:$4 sm:$0xff]  }
  0xe5   : > { %1711 = vmatprep.subr.bf16.mxu1 %v4002_v32  ;;  %v4113_v32 = vld [vmem:[#allocation6 + $0x150] ss:$8 sps:$4 sm:$0xff]  }
  0xe7   : > { %1761 = vmatpush1.bf16.msra.mxu0 %v4003_v35  ;;  %v4083_v35 = vld [vmem:[#allocation6 + $0xf0] ss:$8 sps:$4 sm:$0xff]  }
  0xe8   : > { %1712 = vmatpush2.bf16.msra.mxu1 %v4000_v34  ;;  %1762 = vmatprep.subr.bf16.mxu0 %v4011_v39  ;;  %v4085_v34 = vld [vmem:[#allocation6 + $0xf4] ss:$8 sps:$4 sm:$0xff]  }
  0xe9   : > { %1713 = vmatprep.subr.bf16.mxu1 %v4008_v38  ;;  %v4119_v38 = vld [vmem:[#allocation6 + $0x130] ss:$8 sps:$4 sm:$0xff]   ;;  %v4121_v39 = vld [vmem:[#allocation6 + $0x134] ss:$8 sps:$4 sm:$0xff]  }
  0xeb   : > { %1763 = vmatpush1.bf16.msra.mxu0 %v4009_v41  ;;  %v4124_v41 = vld [vmem:[#allocation6 + $0x124] ss:$8 sps:$4 sm:$0xff]  }
  0xec   : > { %1714 = vmatpush2.bf16.msra.mxu1 %v4006_v40  ;;  %1764 = vmatprep.subr.bf16.mxu0 %v4017_v45  ;;  %v4088_v40 = vld [vmem:[#allocation6 + $0xe4] ss:$8 sps:$4 sm:$0xff]   ;;  %v4122_v45 = vld [vmem:[#allocation6 + $0x120] ss:$8 sps:$4 sm:$0xff]  }
  0xed   : > { %1715 = vmatprep.subr.bf16.mxu1 %v4014_v42  ;;  %v4086_v42 = vld [vmem:[#allocation6 + $0xe0] ss:$8 sps:$4 sm:$0xff]  }
  0xef   : > { %1765 = vmatpush2.bf16.msra.mxu0 %v4015_v47  ;;  %v4089_v47 = vld [vmem:[#allocation6 + $0xd0] ss:$8 sps:$4 sm:$0xff]  }
  0xf0   : > { %1716 = vmatpush2.bf16.msra.mxu1 %v4012_v46  ;;  %1766 = vmatprep.subr.bf16.mxu0 %v4023_v53  ;;  %v4091_v46 = vld [vmem:[#allocation6 + $0xd4] ss:$8 sps:$4 sm:$0xff]   ;;  %v4094_v53 = vld [vmem:[#allocation6 + $0xc4] ss:$8 sps:$4 sm:$0xff]  }
  0xf1   : > { %1717 = vmatprep.subr.bf16.mxu1 %v4020_v48  ;;  %v4127_v48 = vld [vmem:[#allocation6 + $0x114] ss:$8 sps:$4 sm:$0xff]  }
  0xf3   : > { %1767 = vmatpush2.bf16.msra.mxu0 %v4021_v55  ;;  %v4130_v55 = vld [vmem:[#allocation6 + $0x104] ss:$8 sps:$4 sm:$0xff]  }
  0xf4   : > { %1718 = vmatpush2.bf16.msra.mxu1 %v4018_v54  ;;  %1768 = vmatprep.subr.bf16.mxu0 %v4026_v56  ;;  %v4092_v54 = vld [vmem:[#allocation6 + $0xc0] ss:$8 sps:$4 sm:$0xff]   ;;  %v4097_v56 = vld [vmem:[#allocation6 + $0xb4] ss:$8 sps:$4 sm:$0xff]  }
  0xf5   : > { %3438 = vmatprep.subr.msk.bf16.mxu1 %vm1491_vm0, %v3433_v57  ;;  %v4128_v57 = vld [vmem:[#allocation6 + $0x100] ss:$8 sps:$4 sm:$0xff]  }
  0xf7   : > { %1720 = vmatmul.mubr.bf16.vlgmr.msra.gmra.mxu1 %v4660_v17  ;;  %1769 = vmatpush2.bf16.msra.mxu0 %v4024_v59  ;;  %v4049_v17 = vld [vmem:[#allocation4 + $0x32c] ss:$16 sps:$4 sm:$0xff]  }
  0xf8   : > { %1814 = vmatpush1.bf16.msra.mxu1 %v1499_v62  ;;  %1770 = vmatprep.subr.bf16.mxu0 %v4031_v60  ;;  %v4133_v59 = vld [vmem:[#allocation6 + $0x1f4] ss:$8 sps:$4 sm:$0xff]   ;;  %v4100_v60 = vld [vmem:[#allocation6 + $0xa4] ss:$8 sps:$4 sm:$0xff]   ;;  %v4098_v62 = vld [vmem:[#allocation6 + $0xa0] ss:$8 sps:$4 sm:$0xff]  }
  0xf9   : > { %1815 = vmatprep.subr.bf16.mxu1 %v4034_v61  ;;  %1729 = vmatprep.mubr.bf16.mxu1 %v4667_v26  ;;  %v4047_v26 = vld [vmem:[#allocation4 + $0x328] ss:$16 sps:$4 sm:$0xff]  }
  0xfa   : > { %v4131_v61 = vld [vmem:[#allocation6 + $0x1f0] ss:$8 sps:$4 sm:$0xff]  }
  0xfb   : > { %1771 = vmatpush2.bf16.msra.mxu0 %v4029_v63  ;;  %v4136_v63 = vld [vmem:[#allocation6 + $0x1e4] ss:$8 sps:$4 sm:$0xff]  }
  0xfc   : > { %1816 = vmatpush1.bf16.msra.mxu1 %v4032_v2  ;;  %1772 = vmatprep.subr.bf16.mxu0 %v4037_v3  ;;  %v4103_v2 = vld [vmem:[#allocation6 + $0x94] ss:$8 sps:$4 sm:$0xff]   ;;  %v4134_v3 = vld [vmem:[#allocation6 + $0x1e0] ss:$8 sps:$4 sm:$0xff]  }
  0xfd   : > { %1817 = vmatprep.subr.bf16.mxu1 %v4040_v4  ;;  %v4101_v4 = vld [vmem:[#allocation6 + $0x90] ss:$8 sps:$4 sm:$0xff]  }
  0xff   : > { %1730 = vmatmul.mubr.bf16.gmra.mxu1 %v4680_v36  ;;  %1773 = vmatpush2.bf16.msra.mxu0 %v4035_v5  ;;  %v4056_v36 = vld [vmem:[#allocation4 + $0x408] ss:$16 sps:$4 sm:$0xff]   ;;  %v4139_v5 = vld [vmem:[#allocation6 + $0x1d4] ss:$8 sps:$4 sm:$0xff]  }
 0x100   : > { %1818 = vmatpush1.bf16.msra.mxu1 %v4038_v6  ;;  %1774 = vmatprep.subr.bf16.mxu0 %v4043_v7  ;;  %v4106_v6 = vld [vmem:[#allocation6 + $0x84] ss:$8 sps:$4 sm:$0xff]   ;;  %v4137_v7 = vld [vmem:[#allocation6 + $0x1d0] ss:$8 sps:$4 sm:$0xff]  }
 0x101   : > { %1819 = vmatprep.subr.bf16.mxu1 %v4046_v52  ;;  %1739 = vmatprep.mubr.bf16.mxu1 %v4685_v43  ;;  %v4059_v43 = vld [vmem:[#allocation6 + $0x70] ss:$8 sps:$4 sm:$0xff]   ;;  %v4104_v52 = vld [vmem:[#allocation6 + $0x80] ss:$8 sps:$4 sm:$0xff]  }
 0x103   : > { %1775 = vmatpush2.bf16.msra.mxu0 %v4041_v8  ;;  %v4142_v8 = vld [vmem:[#allocation6 + $0x1c4] ss:$8 sps:$4 sm:$0xff]  }
 0x104   : > { %1820 = vmatpush1.bf16.msra.mxu1 %v4044_v9  ;;  %1776 = vmatprep.subr.bf16.mxu0 %v4049_v17  ;;  %v4140_v9 = vld [vmem:[#allocation6 + $0x1c0] ss:$8 sps:$4 sm:$0xff]   ;;  %v4145_v17 = vld [vmem:[#allocation6 + $0x1b4] ss:$8 sps:$4 sm:$0xff]  }
 0x105   : > { %1821 = vmatprep.subr.bf16.mxu1 %v4052_v10  ;;  %v4143_v10 = vld [vmem:[#allocation6 + $0x1b0] ss:$8 sps:$4 sm:$0xff]  }
 0x107   : > { %1740 = vmatmul.mubr.bf16.gmra.mxu1 %v4695_v50  ;;  %1777 = vmatpush2.bf16.msra.mxu0 %v4047_v26  ;;  %v4067_v50 = vld [vmem:[#allocation6 + $0x54] ss:$8 sps:$4 sm:$0xff]   ;;  %v4148_v26 = vld [vmem:[#allocation6 + $0x1a4] ss:$8 sps:$4 sm:$0xff]  }
 0x108   : > { %1822 = vmatpush1.bf16.msra.mxu1 %v4050_v12  ;;  %1778 = vmatprep.subr.bf16.mxu0 %v4055_v13  ;;  %v4146_v12 = vld [vmem:[#allocation6 + $0x1a0] ss:$8 sps:$4 sm:$0xff]   ;;  %v4151_v13 = vld [vmem:[#allocation6 + $0x194] ss:$8 sps:$4 sm:$0xff]  }
 0x109   : > { %1823 = vmatprep.subr.bf16.mxu1 %v4058_v14  ;;  %1841 = vmatprep.mubr.bf16.mxu1 %v4415_v0  ;;  %v4149_v14 = vld [vmem:[#allocation6 + $0x190] ss:$8 sps:$4 sm:$0xff]  }
 0x10b   : > { %1779 = vmatpush2.bf16.msra.mxu0 %v4053_v15  ;;  %v4154_v15 = vld [vmem:[#allocation6 + $0x184] ss:$8 sps:$4 sm:$0xff]  }
 0x10c   : > { %1824 = vmatpush1.bf16.msra.mxu1 %v4056_v36  ;;  %2298 = vmatprep.subr.bf16.mxu0 %v4061_v16  ;;  %v4152_v36 = vld [vmem:[#allocation6 + $0x180] ss:$8 sps:$4 sm:$0xff]  }
 0x10d   : > { %2359 = vmatprep.subr.bf16.mxu1 %v4109_v24 }
 0x10e   : > { %1781 = vmatmul.mubr.bf16.vlgmr.msra.gmra.mxu0 %v4662_v18  ;;  %v4068_v18 = vld [vmem:[#allocation6 + $0x40] ss:$8 sps:$4 sm:$0xff]  }
 0x10f   : > { %3439 = vmatmul.mubr.msk.bf16.vlgmr.msra.gmra.mxu1 %vm1481_vm1, %v4705_v1  ;;  %1790 = vmatprep.mubr.bf16.mxu0 %v4670_v28  ;;  %v4073_v28 = vld [vmem:[#allocation6 + $0x34] ss:$8 sps:$4 sm:$0xff]   ;;  %v4071_v1 = vld [vmem:[#allocation6 + $0x30] ss:$8 sps:$4 sm:$0xff]  }
 0x110   : > { %1851 = vmatprep.mubr.bf16.mxu1 %v4415_v0  ;;  %2299 = vmatpush1.bf16.msra.mxu0 %v4059_v43 }
 0x111   : > { %2300 = vmatprep.subr.bf16.mxu0 %v4064_v19  ;;  %2360 = vmatpush1.bf16.msra.mxu1 %v4107_v27 }
 0x114   : > { %2301 = vmatpush1.bf16.msra.mxu0 %v4062_v20 }
 0x115   : > { %2302 = vmatprep.subr.bf16.mxu0 %v4067_v50 }
 0x116   : > { %1791 = vmatmul.mubr.bf16.gmra.mxu0 %v4682_v37  ;;  %v4074_v37 = vld [vmem:[#allocation6 + $0x20] ss:$8 sps:$4 sm:$0xff]  }
 0x117   : > { %3440 = vmatmul.mubr.msk.bf16.gmra.mxu1 %vm1481_vm1, %v4712_v11  ;;  %1800 = vmatprep.mubr.bf16.mxu0 %v4687_v44  ;;  %v4112_v44 = vld [vmem:[#allocation6 + $0x164] ss:$8 sps:$4 sm:$0xff]   ;;  %v4110_v11 = vld [vmem:[#allocation6 + $0x160] ss:$8 sps:$4 sm:$0xff]  }
 0x118   : > { %1861 = vmatprep.mubr.bf16.mxu1 %v4415_v0  ;;  %2303 = vmatpush1.bf16.msra.mxu0 %v4065_v21  ;;  %v4079_v0 = vld [vmem:[#allocation6 + $0x14] ss:$8 sps:$4 sm:$0xff]  }
 0x119   : > { %2304 = vmatprep.subr.bf16.mxu0 %v4070_v22  ;;  %2361 = vmatprep.subr.bf16.mxu1 %v4112_v44 }
 0x11a   : > { %2362 = vmatpush1.bf16.msra.mxu1 %v4110_v11 }
 0x11b   : > { %2363 = vmatprep.subr.bf16.mxu1 %v4115_v30 }
 0x11c   : > { %2305 = vmatpush1.bf16.msra.mxu0 %v4068_v18 }
 0x11d   : > { %2306 = vmatprep.subr.bf16.mxu0 %v4073_v28  ;;  %v711_v28 = vlaneseq }
 0x11e   : > { %1801 = vmatmul.mubr.bf16.gmra.mxu0 %v4697_v51  ;;  %v4118_v51 = vld [vmem:[#allocation6 + $0x144] ss:$8 sps:$4 sm:$0xff]   ;;  %2364 = vmatpush1.bf16.msra.mxu1 %v4113_v32 }
 0x11f   : > { %3441 = vmatmul.mubr.msk.bf16.gmra.mxu1 %vm1481_vm1, %v4718_v23  ;;  %v4080_v23 = vld [vmem:[#allocation6] ss:$8 sps:$4 sm:$0xff]   ;;  %2365 = vmatprep.subr.bf16.mxu1 %v4118_v51 }
 0x120   : > { %2307 = vmatpush1.bf16.msra.mxu0 %v4071_v1 }
 0x121   : > { %2308 = vmatprep.subr.bf16.mxu0 %v4076_v25 }
 0x122   : > { %2366 = vmatpush1.bf16.msra.mxu1 %v4116_v33 }
 0x123   : > { %2367 = vmatprep.subr.bf16.mxu1 %v4121_v39 }
 0x124   : > { %2309 = vmatpush1.bf16.msra.mxu0 %v4074_v37  ;;  %v4744_v37 = vshrl.u32 %v711_v28, 7 }
 0x125   : > { %2310 = vmatprep.subr.bf16.mxu0 %v4079_v0 }
 0x126   : > { %2368 = vmatpush1.bf16.msra.mxu1 %v4119_v38  ;;  %v717_v30 = vsub.s32 1, %v4744_v37  ;;  %v713_v32 = vsub.s32 0, %v4744_v37 }
 0x127   : > { %2369 = vmatprep.subr.bf16.mxu1 %v4124_v41 }
 0x128   : > { %2311 = vmatpush1.bf16.msra.mxu0 %v4077_v29 }
 0x129   : > { %2312 = vmatprep.subr.bf16.mxu0 %v4082_v31  ;;  %v4750_v31 = vld [vmem:[%s4980_s2] sm:$0xf] }
 0x12a   : > { %2370 = vmatpush1.bf16.msra.mxu1 %v4122_v45  ;;  %v714_v38 = vrot.slane %v4750_v31, %v713_v32 }
 0x12b   : > { %2371 = vmatprep.subr.bf16.mxu1 %v4127_v48 }
 0x12c   : > { %2313 = vmatpush1.bf16.msra.mxu0 %v4080_v23 }
 0x12d   : > { %2314 = vmatprep.subr.bf16.mxu0 %v4085_v34 }
 0x12e   : > { %2372 = vmatpush1.bf16.msra.mxu1 %v4125_v49 }
 0x12f   : > { %2373 = vmatprep.subr.bf16.mxu1 %v4130_v55 }
 0x130   : > { %2315 = vmatpush2.bf16.msra.mxu0 %v4083_v35  ;;  %v718_v35 = vrot.slane %v4750_v31, %v717_v30 }
 0x131   : > { %2316 = vmatprep.subr.bf16.mxu0 %v4088_v40 }
 0x132   : > { %2374 = vmatpush1.bf16.msra.mxu1 %v4128_v57 }
 0x133   : > { %2375 = vmatprep.subr.bf16.mxu1 %v4133_v59 }
 0x134   : > { %2317 = vmatpush2.bf16.msra.mxu0 %v4086_v42 }
 0x135   : > { %2318 = vmatprep.subr.bf16.mxu0 %v4091_v46 }
 0x136   : > { %2376 = vmatpush2.bf16.msra.mxu1 %v4131_v61 }
 0x137   : > { %2377 = vmatprep.subr.bf16.mxu1 %v4136_v63 }
 0x138   : > { %2319 = vmatpush2.bf16.msra.mxu0 %v4089_v47 }
 0x139   : > { %2320 = vmatprep.subr.bf16.mxu0 %v4094_v53 }
 0x13a   : > { %2378 = vmatpush2.bf16.msra.mxu1 %v4134_v3 }
 0x13b   : > { %2379 = vmatprep.subr.bf16.mxu1 %v4139_v5 }
 0x13c   : > { %2321 = vmatpush2.bf16.msra.mxu0 %v4092_v54 }
 0x13d   : > { %2322 = vmatprep.subr.bf16.mxu0 %v4097_v56 }
 0x13e   : > { %2380 = vmatpush2.bf16.msra.mxu1 %v4137_v7 }
 0x13f   : > { %2381 = vmatprep.subr.bf16.mxu1 %v4142_v8 }
 0x140   : > { %2323 = vmatpush2.bf16.msra.mxu0 %v4095_v58 }
 0x141   : > { %2324 = vmatprep.subr.bf16.mxu0 %v4100_v60 }
 0x142   : > { %2382 = vmatpush2.bf16.msra.mxu1 %v4140_v9 }
 0x143   : > { %2383 = vmatprep.subr.bf16.mxu1 %v4145_v17 }
 0x144   : > { %2325 = vmatpush2.bf16.msra.mxu0 %v4098_v62 }
 0x145   : > { %2326 = vmatprep.subr.bf16.mxu0 %v4103_v2 }
 0x146   : > { %2384 = vmatpush2.bf16.msra.mxu1 %v4143_v10 }
 0x147   : > { %2385 = vmatprep.subr.bf16.mxu1 %v4148_v26 }
 0x148   : > { %2327 = vmatpush2.bf16.msra.mxu0 %v4101_v4 }
 0x149   : > { %2328 = vmatprep.subr.bf16.mxu0 %v4106_v6 }
 0x14a   : > { %2386 = vmatpush2.bf16.msra.mxu1 %v4146_v12 }
 0x14b   : > { %2387 = vmatprep.subr.bf16.mxu1 %v4151_v13 }
 0x14c   : > { %2329 = vmatpush2.bf16.msra.mxu0 %v4104_v52 }
 0x14e   : > { %2388 = vmatpush2.bf16.msra.mxu1 %v4149_v14 }
 0x14f   : > { %2389 = vmatprep.subr.bf16.mxu1 %v4154_v15 }
 0x152   : > { %2390 = vmatpush2.bf16.msra.mxu1 %v4152_v36 }
 0x176   : > { %v1538_v16 = vpop.f32.mrf.mxu0 }
 0x177   : > { %v1599_v43 = vpop.f32.mrf.mxu1  ;;  %v1539_v47 = vadd.f32 %v1538_v16, %v714_v38 }
 0x178   : > { %v1540_v19 = vpop.f32.mrf.mxu0 }
 0x179   : > { %v1601_v20 = vpop.f32.mrf.mxu1  ;;  %v1541_v45 = vadd.f32 %v1540_v19, %v718_v35  ;;  %v1600_v56 = vadd.f32 %v1599_v43, %v1539_v47 }
 0x17a   : > { %v1542_v50 = vpop.f32.mrf.mxu0 }
 0x17b   : > { %v1603_v21 = vpop.f32.mrf.mxu1  ;;  %v1543_v46 = vadd.f32 %v1542_v50, %v714_v38  ;;  %v1602_v54 = vadd.f32 %v1601_v20, %v1541_v45 }
 0x17c   : > { %v1544_v22 = vpop.f32.mrf.mxu0 }
 0x17d   : > { %v1605_v18 = vpop.f32.mrf.mxu1  ;;  %v1545_v53 = vadd.f32 %v1544_v22, %v718_v35  ;;  %v1604_v55 = vadd.f32 %v1603_v21, %v1543_v46 }
 0x17e   : > { %v1548_v1 = vpop.f32.mrf.mxu0 }
 0x17f   : > { %v1609_v24 = vpop.f32.mrf.mxu1  ;;  %v1606_v58 = vadd.f32 %v1605_v18, %v1545_v53  ;;  %v1549_v4 = vadd.f32 %v1548_v1, %v714_v38 }
 0x180   : > { %v1550_v25 = vpop.f32.mrf.mxu0 }
 0x181   : > { %v1611_v27 = vpop.f32.mrf.mxu1  ;;  %v1551_v63 = vadd.f32 %v1550_v25, %v718_v35  ;;  %v1610_v13 = vadd.f32 %v1609_v24, %v1549_v4 }
 0x182   : > { %v1552_v44 = vpop.f32.mrf.mxu0 }
 0x183   : > { %v1613_v0 = vpop.f32.mrf.mxu1  ;;  %v1553_v2 = vadd.f32 %v1552_v44, %v714_v38  ;;  %v1612_v10 = vadd.f32 %v1611_v27, %v1551_v63 }
 0x184   : > { %v1554_v11 = vpop.f32.mrf.mxu0 }
 0x185   : > { %v1615_v29 = vpop.f32.mrf.mxu1  ;;  %v1555_v7 = vadd.f32 %v1554_v11, %v718_v35  ;;  %v1614_v26 = vadd.f32 %v1613_v0, %v1553_v2 }
 0x186   : > { %v1558_v51 = vpop.f32.mrf.mxu0 }
 0x187   : > { %v1619_v23 = vpop.f32.mrf.mxu1  ;;  %v1616_v36 = vadd.f32 %v1615_v29, %v1555_v7  ;;  %v1559_v20 = vadd.f32 %v1558_v51, %v714_v38 }
 0x188   : > { %v1560_v33 = vpop.f32.mrf.mxu0 }
 0x189   : > { %v1621_v34 = vpop.f32.mrf.mxu1  ;;  %v1561_v16 = vadd.f32 %v1560_v33, %v718_v35  ;;  %v1620_v44 = vadd.f32 %v1619_v23, %v1559_v20 }
 0x18a   : > { %v1562_v39 = vpop.f32.mrf.mxu0 }
 0x18b   : > { %v1623_v40 = vpop.f32.mrf.mxu1  ;;  %v1622_v1 = vadd.f32 %v1621_v34, %v1561_v16 }
 0x18c   : > { %v1563_v41 = vpop.f32.mrf.mxu0 }
 0x18d   : > { %v1624_v42 = vpop.f32.mrf.mxu1 }
 0x18e   : > { %v1660_v48 = vpop.f32.mrf.mxu0 }
 0x18f   : > { %v1661_v61 = vadd.f32 %v1660_v48, %v1600_v56  ;;  %v721_v56 = vsub.s32 2, %v4744_v37 }
 0x190   : > { %v1662_v49 = vpop.f32.mrf.mxu0 }
 0x191   : > { %v1663_v59 = vadd.f32 %v1662_v49, %v1602_v54  ;;  %v1870_v9 = vmax.f32 %v1661_v61, 0.0 }
 0x192   : > { %v1664_v57 = vpop.f32.mrf.mxu0 }
 0x193   : > { %v1665_v60 = vadd.f32 %v1664_v57, %v1604_v55  ;;  %v1871_v52 = vmax.f32 %v1663_v59, 0.0  ;;  %v725_v55 = vsub.s32 3, %v4744_v37 }
 0x194   : > { %v1666_v62 = vpop.f32.mrf.mxu0 }
 0x195   : > { %v1667_v3 = vadd.f32 %v1666_v62, %v1606_v58  ;;  %v1874_v5 = vmax.f32 %v1665_v60, 0.0  ;;  %v726_v59 = vrot.slane %v4750_v31, %v725_v55  ;;  %v722_v60 = vrot.slane %v4750_v31, %v721_v56 }
 0x196   : > { %v1670_v6 = vpop.f32.mrf.mxu0 }
 0x197   : > { %v1875_v8 = vmax.f32 %v1667_v3, 0.0  ;;  %v1890_v14 = vpack.c.bf16 %v1874_v5, %v1870_v9  ;;  %v1671_v50 = vadd.f32 %v1670_v6, %v1610_v13 }
 0x198   : > { %v1672_v17 = vpop.f32.mrf.mxu0 }
 0x199   : > { %v1891_v12 = vpack.c.bf16 %v1875_v8, %v1871_v52  ;;  %v1673_v43 = vadd.f32 %v1672_v17, %v1612_v10  ;;  %v1878_v0 = vmax.f32 %v1671_v50, 0.0 }
 0x19a   : > { %v1674_v15 = vpop.f32.mrf.mxu0 }
 0x19b   : > { %v1675_v19 = vadd.f32 %v1674_v15, %v1614_v26  ;;  %2330 = vmatprep.mubr.bf16.mxu0 %v1891_v12  ;;  %v1879_v25 = vmax.f32 %v1673_v43, 0.0 }
 0x19c   : > { %v1676_v21 = vpop.f32.mrf.mxu0  ;;  %2331 = vmatmul.mubr.bf16.vlgmr.msra.gmra.mxu0 %v1890_v14 }
 0x19d   : > { %v1677_v22 = vadd.f32 %v1676_v21, %v1616_v36  ;;  %v1882_v18 = vmax.f32 %v1675_v19, 0.0 }
 0x19e   : > { %v1680_v28 = vpop.f32.mrf.mxu0 }
 0x19f   : > { %v1883_v27 = vmax.f32 %v1677_v22, 0.0  ;;  %v1894_v29 = vpack.c.bf16 %v1882_v18, %v1878_v0  ;;  %v1681_v33 = vadd.f32 %v1680_v28, %v1620_v44 }
 0x1a0   : > { %v1682_v24 = vpop.f32.mrf.mxu0 }
 0x1a1   : > { %v1895_v11 = vpack.c.bf16 %v1883_v27, %v1879_v25  ;;  %v1683_v39 = vadd.f32 %v1682_v24, %v1622_v1  ;;  %v1886_v41 = vmax.f32 %v1681_v33, 0.0 }
 0x1a2   : > { %v1684_v35 = vpop.f32.mrf.mxu0 }
 0x1a3   : > { %v1887_v40 = vmax.f32 %v1683_v39, 0.0  ;;  %2340 = vmatprep.mubr.bf16.mxu0 %v1895_v11  ;;  %v1898_v42 = vpack.c.bf16 %v1886_v41, %v1886_v41 }
 0x1a4   : > { %2341 = vmatmul.mubr.bf16.gmra.mxu0 %v1894_v29  ;;  %v1685_v51 = vpop.f32.mrf.mxu0 }
 0x1a5   : > { %v1899_v38 = vpack.c.bf16 %v1887_v40, %v1887_v40 }
 0x1a7   : > { %2350 = vmatprep.mubr.bf16.mxu0 %v1899_v38 }
 0x1ac   : > { %2351 = vmatmul.mubr.bf16.gmra.mxu0 %v1898_v42 }
 0x1b7   : > { %v1721_v34 = vpop.f32.mrf.mxu1 }
 0x1b8   : > { %v1722_v3 = vadd.f32 %v1721_v34, %v722_v60 }
 0x1b9   : > { %v1723_v45 = vpop.f32.mrf.mxu1 }
 0x1ba   : > { %v1724_v2 = vadd.f32 %v1723_v45, %v726_v59 }
 0x1bb   : > { %v1725_v46 = vpop.f32.mrf.mxu1 }
 0x1bc   : > { %v1726_v6 = vadd.f32 %v1725_v46, %v722_v60 }
 0x1bd   : > { %v1727_v23 = vpop.f32.mrf.mxu1 }
 0x1be   : > { %v1728_v17 = vadd.f32 %v1727_v23, %v726_v59 }
 0x1bf   : > { %v1731_v47 = vpop.f32.mrf.mxu1 }
 0x1c0   : > { %v1732_v20 = vadd.f32 %v1731_v47, %v722_v60 }
 0x1c1   : > { %v1733_v48 = vpop.f32.mrf.mxu1 }
 0x1c2   : > { %v1734_v43 = vadd.f32 %v1733_v48, %v726_v59 }
 0x1c3   : > { %v1735_v53 = vpop.f32.mrf.mxu1 }
 0x1c4   : > { %v1736_v18 = vadd.f32 %v1735_v53, %v722_v60 }
 0x1c5   : > { %v1737_v49 = vpop.f32.mrf.mxu1 }
 0x1c6   : > { %v1738_v11 = vadd.f32 %v1737_v49, %v726_v59 }
 0x1c7   : > { %v1741_v54 = vpop.f32.mrf.mxu1 }
 0x1c8   : > { %v1742_v42 = vadd.f32 %v1741_v54, %v722_v60 }
 0x1c9   : > { %v1743_v57 = vpop.f32.mrf.mxu1 }
 0x1ca   : > { %v1744_v23 = vadd.f32 %v1743_v57, %v726_v59 }
 0x1cb   : > { %v1745_v58 = vpop.f32.mrf.mxu1 }
 0x1cd   : > { %v1746_v61 = vpop.f32.mrf.mxu1 }
 0x1ce   : > { %v1782_v62 = vpop.f32.mrf.mxu0 }
 0x1cf   : > { %v1843_v63 = vpop.f32.mrf.mxu1  ;;  %v1783_v52 = vadd.f32 %v1782_v62, %v1722_v3 }
 0x1d0   : > { %v1784_v4 = vpop.f32.mrf.mxu0 }
 0x1d1   : > { %v1845_v5 = vpop.f32.mrf.mxu1  ;;  %v1785_v7 = vadd.f32 %v1784_v4, %v1724_v2  ;;  %v1844_v31 = vadd.f32 %v1843_v63, %v1783_v52 }
 0x1d2   : > { %v1786_v8 = vpop.f32.mrf.mxu0 }
 0x1d3   : > { %v1847_v9 = vpop.f32.mrf.mxu1  ;;  %v1787_v10 = vadd.f32 %v1786_v8, %v1726_v6  ;;  %v1846_v13 = vadd.f32 %v1845_v5, %v1785_v7  ;;  %v1872_v27 = vmax.f32 %v1844_v31, 0.0  ;;  %v4155_v8 = vld [vmem:[%s4983_s5 + $0x78] sm:$0xff]  }
 0x1d4   : > { %v1788_v26 = vpop.f32.mrf.mxu0  ;;  %3561 = vmatprep.subr.bf16.mxu0 %v4155_v8  ;;  %v4164_v31 = vld [vmem:[%s4983_s5 + $0x18] sm:$0xff]  }
 0x1d5   : > { %v1849_v12 = vpop.f32.mrf.mxu1  ;;  %v1848_v14 = vadd.f32 %v1847_v9, %v1787_v10  ;;  %v1789_v15 = vadd.f32 %v1788_v26, %v1728_v17  ;;  %v1873_v28 = vmax.f32 %v1846_v13, 0.0  ;;  %v4156_v9 = vld [vmem:[%s4983_s5 + $0x38] sm:$0xff]   ;;  %v4157_v17 = vld [vmem:[%s4983_s5 + $0x70] sm:$0xff]   ;;  %v4159_v26 = vld [vmem:[%s4983_s5 + $0x68] sm:$0xff]  }
 0x1d6   : > { %v1792_v36 = vpop.f32.mrf.mxu0  ;;  %3562 = vmatpush3.bf16.msra.mxu0 %v4156_v9  ;;  %v4158_v10 = vld [vmem:[%s4983_s5 + $0x30] sm:$0xff]   ;;  %v4161_v13 = vld [vmem:[%s4983_s5 + $0x60] sm:$0xff]  }
 0x1d7   : > { %v1853_v16 = vpop.f32.mrf.mxu1  ;;  %v1850_v19 = vadd.f32 %v1849_v12, %v1789_v15  ;;  %v1876_v50 = vmax.f32 %v1848_v14, 0.0  ;;  %v1793_v44 = vadd.f32 %v1792_v36, %v1732_v20  ;;  %3563 = vmatprep.subr.bf16.mxu0 %v4157_v17  ;;  %v4160_v12 = vld [vmem:[%s4983_s5 + $0x28] sm:$0xff]   ;;  %v4162_v14 = vld [vmem:[%s4983_s5 + $0x20] sm:$0xff]   ;;  %v4163_v15 = vld [vmem:[%s4983_s5 + $0x58] sm:$0xff]  }
 0x1d8   : > { %v1794_v21 = vpop.f32.mrf.mxu0  ;;  %v4165_v36 = vld [vmem:[%s4983_s5 + $0x50] sm:$0xff]   ;;  %v4169_v20 = vld [vmem:[%s4983_s5 + $0x40] sm:$0xff]  }
 0x1d9   : > { %v1855_v22 = vpop.f32.mrf.mxu1  ;;  %v1877_v1 = vmax.f32 %v1850_v19, 0.0  ;;  %v1795_v25 = vadd.f32 %v1794_v21, %v1734_v43  ;;  %v1892_v33 = vpack.c.bf16 %v1876_v50, %v1872_v27  ;;  %v1854_v34 = vadd.f32 %v1853_v16, %v1793_v44  ;;  %v4166_v16 = vld [vmem:[%s4983_s5 + $0x10] sm:$0xff]   ;;  %v4167_v43 = vld [vmem:[%s4983_s5 + $0x48] sm:$0xff]   ;;  %v4170_v50 = vld [vmem:[%s4983_s5] sm:$0xff]  }
 0x1da   : > { %v1796_v0 = vpop.f32.mrf.mxu0  ;;  %3564 = vmatpush3.bf16.msra.mxu0 %v4158_v10  ;;  %v4168_v19 = vld [vmem:[%s4983_s5 + $0x8] sm:$0xff]   ;;  %v4171_v21 = vld [vmem:[%s4985_s7 + $0x38] sm:$0xff]  }
 0x1db   : > { %v1857_v24 = vpop.f32.mrf.mxu1  ;;  %v1893_v39 = vpack.c.bf16 %v1877_v1, %v1873_v28  ;;  %v1797_v29 = vadd.f32 %v1796_v0, %v1736_v18  ;;  %v1856_v51 = vadd.f32 %v1855_v22, %v1795_v25  ;;  %v1880_v62 = vmax.f32 %v1854_v34, 0.0  ;;  %3565 = vmatprep.subr.bf16.mxu0 %v4159_v26  ;;  %v4172_v18 = vld [vmem:[%s4985_s7 + $0x30] sm:$0xff]   ;;  %v4173_v28 = vld [vmem:[%s4985_s7 + $0x28] sm:$0xff]   ;;  %v4174_v1 = vld [vmem:[%s4985_s7 + $0x20] sm:$0xff]  }
 0x1dc   : > { %v1798_v35 = vpop.f32.mrf.mxu0  ;;  %v4416_v22 = vmov 0.0  }
 0x1dd   : > { %v1859_v40 = vpop.f32.mrf.mxu1  ;;  %v1858_v38 = vadd.f32 %v1857_v24, %v1797_v29  ;;  %v1799_v41 = vadd.f32 %v1798_v35, %v1738_v11  ;;  %2391 = vmatprep.mubr.bf16.mxu1 %v1893_v39  ;;  %v1881_v56 = vmax.f32 %v1856_v51, 0.0  ;;  %3620 = vmatprep.subr.bf16.mxu1 %v4416_v22 }
 0x1de   : > { %v1802_v45 = vpop.f32.mrf.mxu0  ;;  %2392 = vmatmul.mubr.bf16.vlgmr.msra.gmra.mxu1 %v1892_v33  ;;  %3566 = vmatpush3.bf16.msra.mxu0 %v4160_v12 }
 0x1df   : > { %v1863_v46 = vpop.f32.mrf.mxu1  ;;  %v1860_v47 = vadd.f32 %v1859_v40, %v1799_v41  ;;  %v1884_v48 = vmax.f32 %v1858_v38, 0.0  ;;  %v1803_v53 = vadd.f32 %v1802_v45, %v1742_v42  ;;  %3567 = vmatprep.subr.bf16.mxu0 %v4161_v13  ;;  %3621 = vmatpush3.bf16.msra.mxu1 %v4171_v21  ;;  %v1966_v38 = vld [vmem:[%s4982_s4] sm:$0x3] }
 0x1e0   : > { %v1804_v55 = vpop.f32.mrf.mxu0  ;;  %3622 = vmatprep.subr.bf16.mxu1 %v4416_v22  ;;  %v1971_v41 = vrot.slane %v1966_v38, %v713_v32  ;;  %v1975_v42 = vrot.slane %v1966_v38, %v717_v30 }
 0x1e1   : > { %v1865_v49 = vpop.f32.mrf.mxu1  ;;  %v1885_v58 = vmax.f32 %v1860_v47, 0.0  ;;  %v1805_v61 = vadd.f32 %v1804_v55, %v1744_v23  ;;  %v1896_v5 = vpack.c.bf16 %v1884_v48, %v1880_v62  ;;  %v1864_v54 = vadd.f32 %v1863_v46, %v1803_v53 }
 0x1e2   : > { %v1806_v63 = vpop.f32.mrf.mxu0  ;;  %3568 = vmatpush3.bf16.msra.mxu0 %v4162_v14 }
 0x1e3   : > { %v1867_v2 = vpop.f32.mrf.mxu1  ;;  %v1897_v3 = vpack.c.bf16 %v1885_v58, %v1881_v56  ;;  %v1866_v4 = vadd.f32 %v1865_v49, %v1805_v61  ;;  %v1888_v59 = vmax.f32 %v1864_v54, 0.0  ;;  %3569 = vmatprep.subr.bf16.mxu0 %v4163_v15  ;;  %3623 = vmatpush3.bf16.msra.mxu1 %v4172_v18 }
 0x1e4   : > { %v1807_v60 = vpop.f32.mrf.mxu0  ;;  %3624 = vmatprep.subr.bf16.mxu1 %v4416_v22 }
 0x1e5   : > { %v1868_v6 = vpop.f32.mrf.mxu1  ;;  %v1889_v7 = vmax.f32 %v1866_v4, 0.0  ;;  %2401 = vmatprep.mubr.bf16.mxu1 %v1897_v3  ;;  %v1900_v52 = vpack.c.bf16 %v1888_v59, %v1888_v59 }
 0x1e6   : > { %2402 = vmatmul.mubr.bf16.gmra.mxu1 %v1896_v5  ;;  %3570 = vmatpush3.bf16.msra.mxu0 %v4164_v31 }
 0x1e7   : > { %v1901_v57 = vpack.c.bf16 %v1889_v7, %v1889_v7  ;;  %3571 = vmatprep.subr.bf16.mxu0 %v4165_v36  ;;  %3625 = vmatpush3.bf16.msra.mxu1 %v4173_v28 }
 0x1e8   : > { %3626 = vmatprep.subr.bf16.mxu1 %v4416_v22 }
 0x1e9   : > { %2411 = vmatprep.mubr.bf16.mxu1 %v1901_v57 }
 0x1ea   : > { %3572 = vmatpush3.bf16.msra.mxu0 %v4166_v16 }
 0x1eb   : > { %3573 = vmatprep.subr.bf16.mxu0 %v4167_v43  ;;  %3627 = vmatpush3.bf16.msra.mxu1 %v4174_v1 }
 0x1ec   : > { %3628 = vmatprep.subr.bf16.mxu1 %v4416_v22 }
 0x1ee   : > { %2412 = vmatmul.mubr.bf16.gmra.mxu1 %v1900_v52  ;;  %3574 = vmatpush3.bf16.msra.mxu0 %v4168_v19 }
 0x1ef   : > { %3575 = vmatprep.subr.bf16.mxu0 %v4169_v20  ;;  %3636 = vmatprep.mubr.msk.bf16.mxu1 %vm4417_vm2, %v4416_v22 }
 0x1f2   : > { %3576 = vmatpush3.bf16.msra.mxu0 %v4170_v50 }
 0x1f3   : > { %3648 = vmatprep.subr.bf16.mxu0 %v4416_v22 }
 0x25c   : > { %v2332_v25 = vpop.f32.mrf.mxu0 }
 0x25d   : > { %v2333_v45 = vadd.f32 %v2332_v25, %v1971_v41  ;;  %v4175_v25 = vld [vmem:[%s4985_s7 + $0x18] sm:$0xff]  }
 0x25e   : > { %v2334_v27 = vpop.f32.mrf.mxu0  ;;  %3629 = vmatpush3.bf16.msra.mxu1 %v4175_v25 }
 0x25f   : > { %v2335_v23 = vadd.f32 %v2334_v27, %v1975_v42  ;;  %3630 = vmatprep.subr.bf16.mxu1 %v4416_v22  ;;  %v4176_v27 = vld [vmem:[%s4985_s7 + $0x10] sm:$0xff]  }
 0x260   : > { %v2336_v44 = vpop.f32.mrf.mxu0 }
 0x261   : > { %v2337_v47 = vadd.f32 %v2336_v44, %v1971_v41  ;;  %v4177_v44 = vld [vmem:[%s4985_s7 + $0x8] sm:$0xff]  }
 0x262   : > { %v2338_v0 = vpop.f32.mrf.mxu0  ;;  %3631 = vmatpush3.bf16.msra.mxu1 %v4176_v27 }
 0x263   : > { %v2339_v55 = vadd.f32 %v2338_v0, %v1975_v42  ;;  %3632 = vmatprep.subr.bf16.mxu1 %v4416_v22  ;;  %v4178_v0 = vld [vmem:[%s4985_s7] sm:$0xff]  }
 0x264   : > { %v2342_v24 = vpop.f32.mrf.mxu0 }
 0x265   : > { %v2343_v3 = vadd.f32 %v2342_v24, %v1971_v41  ;;  %v4179_v24 = vld [vmem:[#allocation7 + $0x18] sm:$0xff]  }
 0x266   : > { %v2344_v11 = vpop.f32.mrf.mxu0  ;;  %3633 = vmatpush3.bf16.msra.mxu1 %v4177_v44 }
 0x267   : > { %v2345_v5 = vadd.f32 %v2344_v11, %v1975_v42  ;;  %3634 = vmatprep.subr.bf16.mxu1 %v4416_v22  ;;  %v4180_v11 = vld [vmem:[#allocation7 + $0x10] sm:$0xff]  }
 0x268   : > { %v2346_v39 = vpop.f32.mrf.mxu0 }
 0x269   : > { %v2347_v54 = vadd.f32 %v2346_v39, %v1971_v41  ;;  %v4181_v39 = vld [vmem:[#allocation7 + $0x8] sm:$0xff]  }
 0x26a   : > { %v2348_v29 = vpop.f32.mrf.mxu0  ;;  %3635 = vmatpush3.bf16.msra.mxu1 %v4178_v0 }
 0x26b   : > { %v2349_v57 = vadd.f32 %v2348_v29, %v1975_v42  ;;  %3668 = vmatprep.subr.bf16.mxu1 %v4416_v22 }
 0x26c   : > { %v2352_v33 = vpop.f32.mrf.mxu0 }
 0x26d   : > { %v2353_v31 = vadd.f32 %v2352_v33, %v1971_v41 }
 0x26e   : > { %v2354_v35 = vpop.f32.mrf.mxu0 }
 0x26f   : > { %v2355_v12 = vadd.f32 %v2354_v35, %v1975_v42 }
 0x270   : > { %v2356_v40 = vpop.f32.mrf.mxu0 }
 0x271   : > { %v3506_v40 = vld [vmem:[%s4984_s6] ss:$0 sm:$0xff] }
 0x272   : > { %v2357_v51 = vpop.f32.mrf.mxu0 }
 0x29e   : > { %v2393_v34 = vpop.f32.mrf.mxu1 }
 0x29f   : > { %v2394_v48 = vadd.f32 %v2393_v34, %v2333_v45 }
 0x2a0   : > { %v2395_v46 = vpop.f32.mrf.mxu1 }
 0x2a1   : > { %v2396_v49 = vadd.f32 %v2395_v46, %v2335_v23  ;;  %v2420_v61 = vmax.f32 %v2394_v48, 0.0 }
 0x2a2   : > { %v2397_v53 = vpop.f32.mrf.mxu1 }
 0x2a3   : > { %v2398_v56 = vadd.f32 %v2397_v53, %v2337_v47  ;;  %v2421_v32 = vmax.f32 %v2396_v49, 0.0 }
 0x2a4   : > { %v2399_v58 = vpop.f32.mrf.mxu1 }
 0x2a5   : > { %v2422_v62 = vmax.f32 %v2398_v56, 0.0  ;;  %v2400_v63 = vadd.f32 %v2399_v58, %v2339_v55 }
 0x2a6   : > { %v2403_v2 = vpop.f32.mrf.mxu1 }
 0x2a7   : > { %v2430_v4 = vpack.c.bf16 %v2422_v62, %v2420_v61  ;;  %v2423_v37 = vmax.f32 %v2400_v63, 0.0  ;;  %v2404_v6 = vadd.f32 %v2403_v2, %v2343_v3 }
 0x2a8   : > { %v2405_v30 = vpop.f32.mrf.mxu1 }
 0x2a9   : > { %v2431_v60 = vpack.c.bf16 %v2423_v37, %v2421_v32  ;;  %v2406_v59 = vadd.f32 %v2405_v30, %v2345_v5  ;;  %v2424_v9 = vmax.f32 %v2404_v6, 0.0  ;;  %v4182_v6 = vld [vmem:[#allocation7] sm:$0xff]  }
 0x2aa   : > { %v2407_v7 = vpop.f32.mrf.mxu1 }
 0x2ab   : > { %v2408_v52 = vadd.f32 %v2407_v7, %v2347_v54  ;;  %2603 = vmatprep.mubr.bf16.mxu0 %v2431_v60  ;;  %v2425_v13 = vmax.f32 %v2406_v59, 0.0  ;;  %v4183_v7 = vld [vmem:[%s4989_s11 + $0x18] sm:$0xff]   ;;  %v4185_v59 = vld [vmem:[%s4989_s11 + $0x8] sm:$0xff]  }
 0x2ac   : > { %v2409_v8 = vpop.f32.mrf.mxu1  ;;  %2604 = vmatmul.mubr.bf16.vlgmr.msra.gmra.mxu0 %v2430_v4 }
 0x2ad   : > { %v2426_v17 = vmax.f32 %v2408_v52, 0.0  ;;  %v2410_v10 = vadd.f32 %v2409_v8, %v2349_v57  ;;  %3649 = vmatpush3.bf16.msra.mxu0 %v4179_v24  ;;  %v4184_v57 = vld [vmem:[%s4989_s11 + $0x10] sm:$0xff]   ;;  %v3523_v52 = vld [vmem:[%s4986_s8] ss:$0 sm:$0xff] }
 0x2ae   : > { %v2413_v26 = vpop.f32.mrf.mxu1  ;;  %3650 = vmatprep.subr.bf16.mxu0 %v4416_v22 }
 0x2af   : > { %v2432_v14 = vpack.c.bf16 %v2426_v17, %v2424_v9  ;;  %v2427_v15 = vmax.f32 %v2410_v10, 0.0  ;;  %v2414_v19 = vadd.f32 %v2413_v26, %v2353_v31 }
 0x2b0   : > { %v2415_v36 = vpop.f32.mrf.mxu1 }
 0x2b1   : > { %v2433_v16 = vpack.c.bf16 %v2427_v15, %v2425_v13  ;;  %v2416_v43 = vadd.f32 %v2415_v36, %v2355_v12  ;;  %v2428_v28 = vmax.f32 %v2414_v19, 0.0  ;;  %3651 = vmatpush3.bf16.msra.mxu0 %v4180_v11  ;;  %v4186_v11 = vld [vmem:[%s4989_s11] sm:$0xff]  }
 0x2b2   : > { %v2417_v20 = vpop.f32.mrf.mxu1  ;;  %3652 = vmatprep.subr.bf16.mxu0 %v4416_v22 }
 0x2b3   : > { %v2429_v50 = vmax.f32 %v2416_v43, 0.0  ;;  %2611 = vmatprep.mubr.bf16.mxu0 %v2433_v16  ;;  %v2434_v1 = vpack.c.bf16 %v2428_v28, %v2428_v28 }
 0x2b4   : > { %v2418_v21 = vpop.f32.mrf.mxu1  ;;  %2612 = vmatmul.mubr.bf16.gmra.mxu0 %v2432_v14 }
 0x2b5   : > { %v2435_v18 = vpack.c.bf16 %v2429_v50, %v2429_v50  ;;  %3653 = vmatpush3.bf16.msra.mxu0 %v4181_v39  ;;  %v3532_v39 = vld [vmem:[%s4988_s10] ss:$0 sm:$0xff] }
 0x2b6   : > { %3654 = vmatprep.subr.bf16.mxu0 %v4416_v22 }
 0x2b7   : > { %2619 = vmatprep.mubr.bf16.mxu0 %v2435_v18 }
 0x2b9   : > { %3655 = vmatpush3.bf16.msra.mxu0 %v4182_v6 }
 0x2bc   : > { %2620 = vmatmul.mubr.bf16.gmra.mxu0 %v2434_v1 }
 0x2bd   : > { %3656 = vmatprep.mubr.msk.bf16.mxu0 %vm4417_vm2, %v4416_v22 }
 0x36c   : > { %v3577_v29 = vpop.f32.mrf.mxu0 }
 0x36e   : > { %v3578_v33 = vpop.f32.mrf.mxu0 }
 0x36f   : > { %v3579_v35 = vadd.f32 %v3578_v33, %v3577_v29 }
 0x370   : > { %v3580_v51 = vpop.f32.mrf.mxu0 }
 0x371   : > { %v2606_v41 = vadd.f32 %v3579_v35, %v3506_v40 }
 0x372   : > { %v3581_v38 = vpop.f32.mrf.mxu0 }
 0x373   : > { %v3582_v42 = vadd.f32 %v3581_v38, %v3580_v51  ;;  %v2627_v23 = vmax.f32 %v2606_v41, 0.0 }
 0x374   : > { %v3583_v34 = vpop.f32.mrf.mxu0 }
 0x375   : > { %v2609_v45 = vadd.f32 %v3582_v42, %v3506_v40 }
 0x376   : > { %v3584_v46 = vpop.f32.mrf.mxu0 }
 0x377   : > { %v2628_v47 = vmax.f32 %v2609_v45, 0.0  ;;  %v3585_v48 = vadd.f32 %v3584_v46, %v3583_v34 }
 0x378   : > { %v3586_v53 = vpop.f32.mrf.mxu0 }
 0x379   : > { %v2632_v55 = vpack.c.bf16 %v2628_v47, %v2627_v23  ;;  %v2614_v56 = vadd.f32 %v3585_v48, %v3506_v40 }
 0x37a   : > { %v3587_v49 = vpop.f32.mrf.mxu0 }
 0x37b   : > { %v3588_v58 = vadd.f32 %v3587_v49, %v3586_v53  ;;  %3637 = vmatmul.mubr.bf16.vlgmr.msra.gmra.mxu1 %v2632_v55  ;;  %v2629_v2 = vmax.f32 %v2614_v56, 0.0 }
 0x37c   : > { %v3589_v61 = vpop.f32.mrf.mxu0  ;;  %3640 = vmatprep.mubr.msk.bf16.mxu1 %vm4417_vm2, %v4416_v22  ;;  %3669 = vmatpush3.bf16.msra.mxu1 %v4183_v7 }
 0x37d   : > { %v2617_v62 = vadd.f32 %v3588_v58, %v3506_v40  ;;  %3670 = vmatprep.subr.bf16.mxu1 %v4416_v22 }
 0x37e   : > { %v3590_v63 = vpop.f32.mrf.mxu0 }
 0x37f   : > { %v2630_v3 = vmax.f32 %v2617_v62, 0.0  ;;  %v3591_v32 = vadd.f32 %v3590_v63, %v3589_v61 }
 0x380   : > { %v3592_v4 = vpop.f32.mrf.mxu0  ;;  %3671 = vmatpush3.bf16.msra.mxu1 %v4184_v57 }
 0x381   : > { %v2622_v37 = vadd.f32 %v3591_v32, %v3506_v40  ;;  %v2633_v30 = vpack.c.bf16 %v2630_v3, %v2629_v2  ;;  %3672 = vmatprep.subr.bf16.mxu1 %v4416_v22  ;;  %v3540_v4 = vld [vmem:[%s5012_s12] ss:$0 sm:$0xff] }
 0x382   : > { %v3593_v5 = vpop.f32.mrf.mxu0 }
 0x383   : > { %3641 = vmatmul.mubr.bf16.gmra.mxu1 %v2633_v30  ;;  %v2631_v54 = vmax.f32 %v2622_v37, 0.0 }
 0x384   : > { %3644 = vmatprep.mubr.msk.bf16.mxu1 %vm4417_vm2, %v4416_v22  ;;  %3673 = vmatpush3.bf16.msra.mxu1 %v4185_v59 }
 0x385   : > { %v2634_v60 = vpack.c.bf16 %v2631_v54, %v2631_v54  ;;  %3674 = vmatprep.subr.bf16.mxu1 %v4416_v22 }
 0x388   : > { %3675 = vmatpush3.bf16.msra.mxu1 %v4186_v11 }
 0x38b   : > { %3645 = vmatmul.mubr.bf16.gmra.mxu1 %v2634_v60 }
 0x38c   : > { %3676 = vmatprep.mubr.msk.bf16.mxu1 %vm4417_vm2, %v4416_v22 }
 0x43b   : > { %v2740_v8 = vpop.f32.mrf.mxu1 }
 0x43c   : > { %v2741_v17 = vadd.f32 %v3523_v52, %v2740_v8 }
 0x43d   : > { %v3638_v9 = vpop.f32.mrf.mxu1 }
 0x43e   : > { %v2762_v13 = vmax.f32 %v2741_v17, 0.0 }
 0x43f   : > { %v2743_v10 = vpop.f32.mrf.mxu1 }
 0x440   : > { %v2744_v26 = vadd.f32 %v3523_v52, %v2743_v10 }
 0x441   : > { %v3639_v12 = vpop.f32.mrf.mxu1 }
 0x442   : > { %v2763_v14 = vmax.f32 %v2744_v26, 0.0 }
 0x443   : > { %v2748_v15 = vpop.f32.mrf.mxu1 }
 0x444   : > { %v2767_v31 = vpack.c.bf16 %v2763_v14, %v2762_v13  ;;  %v2749_v16 = vadd.f32 %v3523_v52, %v2748_v15 }
 0x445   : > { %v3642_v36 = vpop.f32.mrf.mxu1 }
 0x446   : > { %3657 = vmatmul.mubr.msk.bf16.vlgmr.msra.gmra.mxu0 %vm2809_vm3, %v2767_v31  ;;  %v2764_v50 = vmax.f32 %v2749_v16, 0.0 }
 0x447   : > { %v2751_v43 = vpop.f32.mrf.mxu1  ;;  %3660 = vmatprep.mubr.msk.bf16.mxu0 %vm4417_vm2, %v4416_v22 }
 0x448   : > { %v2752_v19 = vadd.f32 %v3523_v52, %v2751_v43 }
 0x449   : > { %v3643_v20 = vpop.f32.mrf.mxu1 }
 0x44a   : > { %v2765_v21 = vmax.f32 %v2752_v19, 0.0 }
 0x44b   : > { %v2756_v18 = vpop.f32.mrf.mxu1 }
 0x44c   : > { %v2768_v28 = vpack.c.bf16 %v2765_v21, %v2764_v50  ;;  %v2757_v1 = vadd.f32 %v3523_v52, %v2756_v18 }
 0x44d   : > { %v3646_v25 = vpop.f32.mrf.mxu1 }
 0x44e   : > { %3661 = vmatmul.mubr.msk.bf16.gmra.mxu0 %vm2809_vm3, %v2768_v28  ;;  %v2766_v44 = vmax.f32 %v2757_v1, 0.0 }
 0x44f   : > { %v2759_v27 = vpop.f32.mrf.mxu1  ;;  %3664 = vmatprep.mubr.msk.bf16.mxu0 %vm4417_vm2, %v4416_v22 }
 0x450   : > { %v2769_v24 = vpack.c.bf16 %v2766_v44, %v2766_v44 }
 0x451   : > { %v3647_v0 = vpop.f32.mrf.mxu1 }
 0x456   : > { %3665 = vmatmul.mubr.msk.bf16.gmra.mxu0 %vm2809_vm3, %v2769_v24 }
 0x506   : > { %v2853_v29 = vpop.f32.mrf.mxu0 }
 0x507   : > { %v2854_v35 = vadd.f32 %v3532_v39, %v2853_v29 }
 0x508   : > { %v3658_v33 = vpop.f32.mrf.mxu0 }
 0x509   : > { %v2875_v41 = vmax.f32 %v2854_v35, 0.0 }
 0x50a   : > { %v2856_v40 = vpop.f32.mrf.mxu0 }
 0x50b   : > { %v2857_v51 = vadd.f32 %v3532_v39, %v2856_v40 }
 0x50c   : > { %v3659_v38 = vpop.f32.mrf.mxu0 }
 0x50d   : > { %v2876_v42 = vmax.f32 %v2857_v51, 0.0 }
 0x50e   : > { %v2861_v34 = vpop.f32.mrf.mxu0 }
 0x50f   : > { %v2880_v45 = vpack.c.bf16 %v2876_v42, %v2875_v41  ;;  %v2862_v23 = vadd.f32 %v3532_v39, %v2861_v34 }
 0x510   : > { %v3662_v46 = vpop.f32.mrf.mxu0 }
 0x511   : > { %3677 = vmatmul.mubr.msk.bf16.vlgmr.msra.gmra.mxu1 %vm2809_vm3, %v2880_v45  ;;  %v2877_v55 = vmax.f32 %v2862_v23, 0.0 }
 0x512   : > { %v2864_v47 = vpop.f32.mrf.mxu0  ;;  %3680 = vmatprep.mubr.msk.bf16.mxu1 %vm4417_vm2, %v4416_v22 }
 0x513   : > { %v2865_v48 = vadd.f32 %v3532_v39, %v2864_v47 }
 0x514   : > { %v3663_v53 = vpop.f32.mrf.mxu0 }
 0x515   : > { %v2878_v49 = vmax.f32 %v2865_v48, 0.0 }
 0x516   : > { %v2869_v56 = vpop.f32.mrf.mxu0 }
 0x517   : > { %v2881_v58 = vpack.c.bf16 %v2878_v49, %v2877_v55  ;;  %v2870_v61 = vadd.f32 %v3532_v39, %v2869_v56 }
 0x518   : > { %v3666_v62 = vpop.f32.mrf.mxu0 }
 0x519   : > { %3681 = vmatmul.mubr.msk.bf16.gmra.mxu1 %vm2809_vm3, %v2881_v58  ;;  %v2879_v2 = vmax.f32 %v2870_v61, 0.0 }
 0x51a   : > { %v2872_v63 = vpop.f32.mrf.mxu0  ;;  %3684 = vmatprep.mubr.msk.bf16.mxu1 %vm4417_vm2, %v4416_v22 }
 0x51b   : > { %v2882_v32 = vpack.c.bf16 %v2879_v2, %v2879_v2 }
 0x51c   : > { %v3667_v3 = vpop.f32.mrf.mxu0 }
 0x521   : > { %3685 = vmatmul.mubr.msk.bf16.gmra.mxu1 %vm2809_vm3, %v2882_v32 }
 0x5d1   : > { %v2965_v37 = vpop.f32.mrf.mxu1 }
 0x5d2   : > { %v2966_v30 = vadd.f32 %v3540_v4, %v2965_v37 }
 0x5d3   : > { %v3678_v5 = vpop.f32.mrf.mxu1 }
 0x5d4   : > { %2988 = vst.msk [vmem:[%s4907_s19] sm:$0xff] %vm2987_vm4, %v2966_v30 }
 0x5d5   : > { %v2968_v22 = vpop.f32.mrf.mxu1 }
 0x5d6   : > { %v2969_v54 = vadd.f32 %v3540_v4, %v2968_v22 }
 0x5d7   : > { %v3679_v60 = vpop.f32.mrf.mxu1 }
 0x5d8   : > { %2989 = vst.msk [vmem:[%s4907_s19 + $0x8] sm:$0xff] %vm2987_vm4, %v2969_v54 }
 0x5d9   : > { %v2973_v6 = vpop.f32.mrf.mxu1 }
 0x5da   : > { %v2974_v7 = vadd.f32 %v3540_v4, %v2973_v6 }
 0x5db   : > { %v3682_v57 = vpop.f32.mrf.mxu1 }
 0x5dc   : > { %2990 = vst.msk [vmem:[%s4907_s19 + $0x10] sm:$0xff] %vm2987_vm4, %v2974_v7 }
 0x5dd   : > { %v2976_v59 = vpop.f32.mrf.mxu1 }
 0x5de   : > { %v2977_v52 = vadd.f32 %v3540_v4, %v2976_v59 }
 0x5df   : > { %v3683_v8 = vpop.f32.mrf.mxu1 }
 0x5e0   : > { %2991 = vst.msk [vmem:[%s4907_s19 + $0x18] sm:$0xff] %vm2987_vm4, %v2977_v52 }
 0x5e1   : > { %v2981_v9 = vpop.f32.mrf.mxu1 }
 0x5e2   : > { %v2982_v17 = vadd.f32 %v3540_v4, %v2981_v9 }
 0x5e3   : > { %v3686_v10 = vpop.f32.mrf.mxu1  ;;  %2999 = sbr.rel (!%p5014_p8) target bundleno = 1565 (0x61d), region = 92 }
 0x5e4   : > { %2992 = vst.msk [vmem:[%s4907_s19 + $0x20] sm:$0xff] %vm2987_vm4, %v2982_v17 }
 0x5e5   : > { %v2984_v26 = vpop.f32.mrf.mxu1 }
 0x5e7   : > { %v3687_v12 = vpop.f32.mrf.mxu1 }
 0x5e8   : > { %s5027_s14 = smov (!%p3002_p10, %s3001_s14), 5 }
 0x5e9   : > { %s3548_s15 = sshll.u32 %s5027_s14, 7 }
 0x5ea   : > { %p3551_p9 = scmp.eq.s32.totalorder %s3548_s15, 0 }
 0x5eb   : > { %4187 = sdivrem.u32 (!%p3551_p9), %s5027_s14, 5 }
 0x5ec   : > { %3010 = sbr.rel (%p3551_p9) target bundleno = 1565 (0x61d), region = 96 }
 0x5f4   : > { %s4932_s30 = spop.drf %4187 }
 0x5f5   : > { %p3552_p12 = scmp.le.s32.totalorder %s4932_s30, 0 }
 0x5f6   : > { %s5016_s29 = smov (!%p3552_p12), %s4926_s16  ;;  %s5017_s13 = smov (!%p3552_p12), %s4907_s19 }
 0x5f7   : > { %3193 = sbr.rel (%p3552_p12) target bundleno = 1540 (0x604), region = 178  ;;  %s4941_s22 = smov (!%p3552_p12), 0  }
 0x5f8   : > { %s4943_s17 = smov (!%p3552_p12), 0  }
 0x5fc LB: >> { %v3083_v13 = vld [vmem:[%s4377_s13] sm:$0xff]  ;;  %v3085_v14 = vld [vmem:[%s4377_s13 + $0x8] sm:$0xff]  ;;  %v3087_v15 = vld [vmem:[%s4377_s13 + $0x10] sm:$0xff]  ;;  %s3093_s21 = sadd.s32 1, %s4381_s22  ;;  %s3077_s17 = sadd.s32 1, %s4385_s17   ;;  %s4385_s17 = sphi %s4943_s17, %s3077_s17   ;;  %s4381_s22 = sphi %s4941_s22, %s5018_s22   ;;  %s4377_s13 = sphi %s5017_s13, %s3098_s13   ;;  %s4373_s29 = sphi %s5016_s29, %s3099_s29  }
 0x5fd   : >> { %3084 = vst [vmem:[%s4373_s29] sm:$0xff] %v3083_v13  ;;  %3086 = vst [vmem:[%s4373_s29 + $0x8] sm:$0xff] %v3085_v14  ;;  %v3089_v31 = vld [vmem:[%s4377_s13 + $0x18] sm:$0xff]  ;;  %v3091_v36 = vld [vmem:[%s4377_s13 + $0x20] sm:$0xff]  ;;  %p3094_p1 = scmp.ge.s32.totalorder %s3093_s21, %s4932_s30  ;;  %p3076_p2 = scmp.ge.s32.totalorder %s3077_s17, %s4932_s30 }
 0x5fe   : >> { %3088 = vst [vmem:[%s4373_s29 + $0x10] sm:$0xff] %v3087_v15  ;;  %3090 = vst [vmem:[%s4373_s29 + $0x18] sm:$0xff] %v3089_v31 }
 0x5ff   : >> { %3092 = vst [vmem:[%s4373_s29 + $0x20] sm:$0xff] %v3091_v36  ;;  %s5029_s21 = smov (%p3094_p1, %s3093_s21), 0  ;;  %3079 = sbr.rel (!%p3076_p2) target bundleno = 1532 (0x5fc), region = 184 }
 0x600   : >> { %s3096_s12 = smul.u32 40, %s5029_s21  ;;  %s5018_s22 = smov %s5029_s21 }
 0x602   : >> { %s3098_s13 = scalar_lea.vmem %s4907_s19, %s3096_s12 [#allocation9]   ;;  %s3099_s29 = scalar_lea.vmem %s4926_s16, %s3096_s12  }
 0x604 PF: > { %4189 = sdivrem.u32 %s5027_s14, 5 }
 0x605   : > { %s3553_s24 = smul.u32 40, %s4932_s30 }
 0x607   : > { %s3104_s25 = scalar_lea.vmem %s4907_s19, %s3553_s24 [#allocation9]   ;;  %s3106_s28 = scalar_lea.vmem %s4926_s16, %s3553_s24  }
 0x60d   : > { %s4190_s23 = spop.drf %4189 }
 0x60e   : > { %p3555_p0 = scmp.le.s32.totalorder %s4190_s23, 0 }
 0x60f   : > { %s4387_s18 = smov (!%p3555_p0), %s3106_s28   ;;  %s4391_s20 = smov (!%p3555_p0), %s3104_s25  }
 0x610   : > { %3207 = sbr.rel (%p3555_p0) target bundleno = 1565 (0x61d), region = 189  ;;  %s4395_s15 = smov (!%p3555_p0), 0  }
 0x611   : > { %s4399_s12 = smov (!%p3555_p0), 0  }
 0x615 LB: >> { %v3116_v16 = vld [vmem:[%s4393_s20] sm:$0xff]  ;;  %s3118_s29 = sadd.s32 1, %s4397_s15  ;;  %s3110_s12 = sadd.s32 1, %s4401_s12   ;;  %s4401_s12 = sphi %s4399_s12, %s3110_s12   ;;  %s4397_s15 = sphi %s4395_s15, %s4396_s15   ;;  %s4393_s20 = sphi %s4391_s20, %s3123_s20   ;;  %s4389_s18 = sphi %s4387_s18, %s3124_s18  }
 0x616   : >> { %3117 = vst [vmem:[%s4389_s18] sm:$0xff] %v3116_v16  ;;  %p3119_p13 = scmp.ge.s32.totalorder %s3118_s29, %s4190_s23  ;;  %p3109_p6 = scmp.ge.s32.totalorder %s3110_s12, %s4190_s23 }
 0x618   : >> { %s5031_s29 = smov (%p3119_p13, %s3118_s29), 0  ;;  %3112 = sbr.rel (!%p3109_p6) target bundleno = 1557 (0x615), region = 195 }
 0x619   : >> { %s3556_s19 = sshll.u32 %s5031_s29, 3  ;;  %s4396_s15 = smov %s5031_s29  }
 0x61a   : >> { %s3123_s20 = scalar_lea.vmem %s3104_s25, %s3556_s19 [#allocation9]   ;;  %s3124_s18 = scalar_lea.vmem %s3106_s28, %s3556_s19  }
 0x61d PF: > { %s5019_s28 = sld [smem:[#allocation13_spill]]  ;;  %s5021_s25 = smov %s4361_s26 }
 0x61e   : > { %s5020_s14 = sld [smem:[#allocation14_spill]]  ;;  %s5022_s26 = smov %s4365_s27 }
 0x623   : > { %p25_p3 = scmp.ge.s32.totalorder %s5019_s28, 4  }
 0x624   : > { %s5023_s27 = smov %s5020_s14 }
 0x625   :  { %27 = sbr.rel (!%p25_p3) target bundleno = 8 (0x8), region = 206 }
 0x62a   :  { %3140 = vsyncpa [#allocation3], 1 }
 0x62b   :  { %3142 = vsyncpa [#allocation3 + $0x1], 1 }
 0x62c   :  { %3143 = vsyncpa [#allocation5], 1 }
 0x62d   :  { %3144 = vsyncpa [#allocation8], 1 }

</bundles_post_ra>
